<compile_context>
chip_gen: v5e
topology: v5e:2x2
jax: 0.10.0
libtpu: 0.0.40
codegen_flags: <defaults>
</compile_context>

<pallas_src>
import functools

import jax
import jax.numpy as jnp
from jax.experimental import pallas as pl
from jax.experimental.pallas import tpu as pltpu


def _round_up(x: int, m: int) -> int:
    return (x + m - 1) // m * m


def _pick_batch_block(n: int) -> int:
    """Batch (sublane / MXU-row) block size.
    <=128: one full-dim block -> no batch padding, single grid step.
    (128,256]: two 128-row blocks so both v7x TensorCores get a 'parallel' block.
    >256: 256-row blocks (full MXU height on v6e/v7x)."""
    if n <= 128:
        return n
    if n <= 256:
        return 128
    return 256


def _pick_k_tile(dp: int, tk_max: int = 4096) -> tuple[int, int]:
    """Contraction tile (multiple of 128) and possibly-padded contraction size."""
    if dp <= tk_max:
        return dp, dp
    for tk in range(tk_max, 127, -128):        # prefer a divisor -> no K padding
        if dp % tk == 0:
            return tk, dp
    return tk_max, _round_up(dp, tk_max)


def _convmean_kernel(x_ref, a_ref, o_ref, acc_ref):
    # grid = (batch blocks [parallel], K blocks [arbitrary / reduction, last])
    k = pl.program_id(1)

    @pl.when(k == 0)
    def _():
        acc_ref[...] = jnp.zeros_like(acc_ref)

    acc_ref[...] += jnp.dot(x_ref[...], a_ref[...],
                            preferred_element_type=jnp.float32)

    @pl.when(k == pl.num_programs(1) - 1)
    def _():
        o_ref[...] = acc_ref[...].astype(o_ref.dtype)


@functools.partial(jax.jit, static_argnames=("use_bf16", "single_buffer_weight"))
def combo_conv2d_meandim(x, weight, *, use_bf16=False, single_buffer_weight=True):
    """x: (N, Cin, H, W) NCHW, weight: (Cout, Cin, KH, KW) OIHW.
    Returns (N, Cout, 1, 1) == AdaptiveAvgPool2d((1,1))(Conv2d(x)) with
    stride=1, padding=0, dilation=1, bias=False (the fold requires exactly that)."""
    N, Cin, H, W = x.shape
    Cout, Cin_w, KH, KW = weight.shape
    assert Cin_w == Cin and H >= KH and W >= KW, "invalid conv shapes"
    OH, OW = H - KH + 1, W - KW + 1            # 'valid' conv output size
    P = OH * OW                                # true pooling count
    D = Cin * H * W

    # ---- effective-weight transform (single vectorized op chain, fused under jit)
    # eff[o,i,h,w] = sum_{kh<=h<kh+OH, kw<=w<kw+OW} weight[o,i,kh,kw]
    # expressed as two tiny 0/1 matmuls (separable box-sum of the kernel).
    h_idx, kh_idx = jnp.arange(H)[None, :], jnp.arange(KH)[:, None]
    mh = ((h_idx >= kh_idx) & (h_idx < kh_idx + OH)).astype(jnp.float32)   # (KH, H)
    w_idx, kw_idx = jnp.arange(W)[None, :], jnp.arange(KW)[:, None]
    mw = ((w_idx >= kw_idx) & (w_idx < kw_idx + OW)).astype(jnp.float32)   # (KW, W)
    eff = jnp.einsum("oikl,kh,lw->oihw", weight.astype(jnp.float32), mh, mw)
    eff = eff / jnp.float32(P)                 # fold the AdaptiveAvgPool mean
    a_mat = eff.reshape(Cout, D).T             # (D, Cout); C-order matches x.reshape

    # ---- tiling & lane/sublane-dense zero padding (exact: zero rows/cols of the
    #      contraction don't change the dot; the mean already used the true P)
    Cp = _round_up(Cout, 128)                  # Cout=10 -> one lane-dense 128 tile
    bb = _pick_batch_block(N)
    Np = _round_up(N, bb)                      # == N whenever N <= 128 (no batch pad)
    tk, Dp = _pick_k_tile(_round_up(D, 128))
    nk = Dp // tk

    cdt = jnp.bfloat16 if use_bf16 else jnp.float32
    x_p = jnp.pad(x.reshape(N, D).astype(jnp.float32),
                  ((0, Np - N), (0, Dp - D))).astype(cdt)
    a_p = jnp.pad(a_mat, ((0, Dp - D), (0, Cp - Cout))).astype(cdt)

    # Weight block is grid-invariant only with a single K block; single-buffer it
    # then to halve its VMEM footprint (most valuable on v7x's 64 MiB VMEM).
    if single_buffer_weight and nk == 1:
        a_spec = pl.BlockSpec((tk, Cp), lambda i, k: (k, 0),
                              pipeline_mode=pl.Buffered(1))
    else:
        a_spec = pl.BlockSpec((tk, Cp), lambda i, k: (k, 0))

    out = pl.pallas_call(
        _convmean_kernel,
        out_shape=jax.ShapeDtypeStruct((Np, Cp), jnp.float32),
        grid_spec=pltpu.PrefetchScalarGridSpec(
            num_scalar_prefetch=0,
            grid=(Np // bb, nk),
            in_specs=[
                pl.BlockSpec((bb, tk), lambda i, k: (i, k)),
                a_spec,
            ],
            out_specs=pl.BlockSpec((bb, Cp), lambda i, k: (i, 0)),
            scratch_shapes=[pltpu.VMEM((bb, Cp), jnp.float32)],
        ),
        compiler_params=pltpu.CompilerParams(
            dimension_semantics=("parallel", "arbitrary"),
            vmem_limit_bytes=32 * 1024 * 1024,
        ),
    )(x_p, a_p)

    # strip padding, restore PyTorch (N, Cout, 1, 1) layout
    return out[:N, :Cout].reshape(N, Cout, 1, 1).astype(x.dtype)


if __name__ == "__main__":
    key = jax.random.PRNGKey(0)
    kx, kw = jax.random.split(key)

    # Small shapes consistent with the module (Cin=3, Cout=10, kernel=5, no bias).
    N, Cin, H, W = 2, 3, 32, 32
    Cout, KH, KW = 10, 5, 5

    x = jax.random.normal(kx, (N, Cin, H, W), dtype=jnp.float32)
    fan_in = Cin * KH * KW
    weight = jax.random.normal(kw, (Cout, Cin, KH, KW), dtype=jnp.float32) / jnp.sqrt(fan_in)

    try:
        out = jax.block_until_ready(
            combo_conv2d_meandim(x, weight, single_buffer_weight=True))
    except Exception:
        # pl.Buffered(1) not supported by this jax/libtpu combo -> default buffering
        out = jax.block_until_ready(
            combo_conv2d_meandim(x, weight, single_buffer_weight=False))

    # Self-check against a plain-JAX reference of the same forward pass.
    ref = jax.lax.conv_general_dilated(
        x, weight, window_strides=(1, 1), padding="VALID",
        dimension_numbers=("NCHW", "OIHW", "NCHW")).mean(axis=(2, 3), keepdims=True)

    assert out.shape == (N, Cout, 1, 1)
    # the mean-before-matmul fold changes fp summation order -> fp tolerance
    assert jnp.allclose(out, ref, rtol=5e-4, atol=5e-4), float(jnp.abs(out - ref).max())

    print("KERNEL_OK")
</pallas_src>

<mosaic_0001>
module attributes {stable_mosaic.version = 11 : i64} {
  func.func @_convmean_kernel(%arg0: i32, %arg1: i32, %arg2: memref<2x3072xf32, #tpu.memory_space<vmem>>, %arg3: memref<3072x128xf32, #tpu.memory_space<vmem>>, %arg4: memref<2x128xf32, #tpu.memory_space<vmem>>, %arg5: memref<2x128xf32, #tpu.memory_space<vmem>>) attributes {dimension_semantics = [#tpu.dimension_semantics<parallel>, #tpu.dimension_semantics<arbitrary>], iteration_bounds = array<i64: 1, 1>, scalar_prefetch = 0 : i64, scratch_operands = 1 : i64, tpu.core_type = #tpu.core_type<tc>, window_params = [{transform_indices = @transform_0, window_bounds = array<i64: 2, 3072>}, {pipeline_mode = #tpu.pipeline_mode<synchronous>, transform_indices = @transform_1, window_bounds = array<i64: 3072, 128>}, {transform_indices = @transform_2, window_bounds = array<i64: 2, 128>}]} {
    %c0_i32 = arith.constant 0 : i32
    %0 = arith.cmpi eq, %arg1, %c0_i32 : i32
    %1 = arith.extui %0 : i1 to i32
    %c0_i32_0 = arith.constant 0 : i32
    %2 = arith.cmpi ne, %1, %c0_i32_0 : i32
    scf.if %2 {
      %cst_10 = arith.constant 0.000000e+00 : f32
      %12 = vector.broadcast %cst_10 : f32 to vector<2x128xf32>
      %c0_11 = arith.constant 0 : index
      %c0_12 = arith.constant 0 : index
      %13 = vector.load %arg5[%c0_11, %c0_12] : memref<2x128xf32, #tpu.memory_space<vmem>>, vector<2x128xf32>
      tpu.vector_store %arg5[%c0_11, %c0_12], %12 {strides = array<i32>} : memref<2x128xf32, #tpu.memory_space<vmem>>, vector<2x128xf32>,
    } else {
    }
    %c0 = arith.constant 0 : index
    %c0_1 = arith.constant 0 : index
    %3 = vector.load %arg5[%c0, %c0_1] : memref<2x128xf32, #tpu.memory_space<vmem>>, vector<2x128xf32>
    %c0_2 = arith.constant 0 : index
    %c0_3 = arith.constant 0 : index
    %4 = vector.load %arg2[%c0_2, %c0_3] : memref<2x3072xf32, #tpu.memory_space<vmem>>, vector<2x3072xf32>
    %c0_4 = arith.constant 0 : index
    %c0_5 = arith.constant 0 : index
    %5 = vector.load %arg3[%c0_4, %c0_5] : memref<3072x128xf32, #tpu.memory_space<vmem>>, vector<3072x128xf32>
    %cst = arith.constant dense<0.000000e+00> : vector<2x128xf32>
    %6 = tpu.matmul %4, %5, %cst {dimension_numbers = #tpu.dot_dimension_numbers<[1], [0], [0], [1], [0, 0, 1, 1], [], []>} : vector<2x3072xf32>, vector<3072x128xf32>, vector<2x128xf32> -> vector<2x128xf32>
    %7 = arith.addf %3, %6 : vector<2x128xf32>
    %c0_6 = arith.constant 0 : index
    %c0_7 = arith.constant 0 : index
    %8 = vector.load %arg5[%c0_6, %c0_7] : memref<2x128xf32, #tpu.memory_space<vmem>>, vector<2x128xf32>
    tpu.vector_store %arg5[%c0_6, %c0_7], %7 {strides = array<i32>} : memref<2x128xf32, #tpu.memory_space<vmem>>, vector<2x128xf32>,
    %c0_i32_8 = arith.constant 0 : i32
    %9 = arith.cmpi eq, %arg1, %c0_i32_8 : i32
    %10 = arith.extui %9 : i1 to i32
    %c0_i32_9 = arith.constant 0 : i32
    %11 = arith.cmpi ne, %10, %c0_i32_9 : i32
    scf.if %11 {
      %c0_10 = arith.constant 0 : index
      %c0_11 = arith.constant 0 : index
      %12 = vector.load %arg5[%c0_10, %c0_11] : memref<2x128xf32, #tpu.memory_space<vmem>>, vector<2x128xf32>
      %c0_12 = arith.constant 0 : index
      %c0_13 = arith.constant 0 : index
      %13 = vector.load %arg4[%c0_12, %c0_13] : memref<2x128xf32, #tpu.memory_space<vmem>>, vector<2x128xf32>
      tpu.vector_store %arg4[%c0_12, %c0_13], %12 {strides = array<i32>} : memref<2x128xf32, #tpu.memory_space<vmem>>, vector<2x128xf32>,
    } else {
    }
    return
  }
  func.func @transform_0(%arg0: i32, %arg1: i32) -> (i32, i32) {
    %c0_i32 = arith.constant 0 : i32
    return %arg0, %arg1 : i32, i32
  }
  func.func @transform_1(%arg0: i32, %arg1: i32) -> (i32, i32) {
    %c0_i32 = arith.constant 0 : i32
    %c0_i32_0 = arith.constant 0 : i32
    return %arg1, %c0_i32 : i32, i32
  }
  func.func @transform_2(%arg0: i32, %arg1: i32) -> (i32, i32) {
    %c0_i32 = arith.constant 0 : i32
    %c0_i32_0 = arith.constant 0 : i32
    return %arg0, %c0_i32 : i32, i32
  }
}

module attributes {stable_mosaic.version = 11 : i64} {
  func.func @_convmean_kernel(%arg0: i32, %arg1: i32, %arg2: memref<2x3072xf32, #tpu.memory_space<vmem>>, %arg3: memref<3072x128xf32, #tpu.memory_space<vmem>>, %arg4: memref<2x128xf32, #tpu.memory_space<vmem>>, %arg5: memref<2x128xf32, #tpu.memory_space<vmem>>) attributes {dimension_semantics = [#tpu.dimension_semantics<parallel>, #tpu.dimension_semantics<arbitrary>], iteration_bounds = array<i64: 1, 1>, scalar_prefetch = 0 : i64, scratch_operands = 1 : i64, tpu.core_type = #tpu.core_type<tc>, window_params = [{transform_indices = @transform_0, window_bounds = array<i64: 2, 3072>}, {transform_indices = @transform_1, window_bounds = array<i64: 3072, 128>}, {transform_indices = @transform_2, window_bounds = array<i64: 2, 128>}]} {
    %c0_i32 = arith.constant 0 : i32
    %0 = arith.cmpi eq, %arg1, %c0_i32 : i32
    %1 = arith.extui %0 : i1 to i32
    %c0_i32_0 = arith.constant 0 : i32
    %2 = arith.cmpi ne, %1, %c0_i32_0 : i32
    scf.if %2 {
      %cst_10 = arith.constant 0.000000e+00 : f32
      %12 = vector.broadcast %cst_10 : f32 to vector<2x128xf32>
      %c0_11 = arith.constant 0 : index
      %c0_12 = arith.constant 0 : index
      %13 = vector.load %arg5[%c0_11, %c0_12] : memref<2x128xf32, #tpu.memory_space<vmem>>, vector<2x128xf32>
      tpu.vector_store %arg5[%c0_11, %c0_12], %12 {strides = array<i32>} : memref<2x128xf32, #tpu.memory_space<vmem>>, vector<2x128xf32>,
    } else {
    }
    %c0 = arith.constant 0 : index
    %c0_1 = arith.constant 0 : index
    %3 = vector.load %arg5[%c0, %c0_1] : memref<2x128xf32, #tpu.memory_space<vmem>>, vector<2x128xf32>
    %c0_2 = arith.constant 0 : index
    %c0_3 = arith.constant 0 : index
    %4 = vector.load %arg2[%c0_2, %c0_3] : memref<2x3072xf32, #tpu.memory_space<vmem>>, vector<2x3072xf32>
    %c0_4 = arith.constant 0 : index
    %c0_5 = arith.constant 0 : index
    %5 = vector.load %arg3[%c0_4, %c0_5] : memref<3072x128xf32, #tpu.memory_space<vmem>>, vector<3072x128xf32>
    %cst = arith.constant dense<0.000000e+00> : vector<2x128xf32>
    %6 = tpu.matmul %4, %5, %cst {dimension_numbers = #tpu.dot_dimension_numbers<[1], [0], [0], [1], [0, 0, 1, 1], [], []>} : vector<2x3072xf32>, vector<3072x128xf32>, vector<2x128xf32> -> vector<2x128xf32>
    %7 = arith.addf %3, %6 : vector<2x128xf32>
    %c0_6 = arith.constant 0 : index
    %c0_7 = arith.constant 0 : index
    %8 = vector.load %arg5[%c0_6, %c0_7] : memref<2x128xf32, #tpu.memory_space<vmem>>, vector<2x128xf32>
    tpu.vector_store %arg5[%c0_6, %c0_7], %7 {strides = array<i32>} : memref<2x128xf32, #tpu.memory_space<vmem>>, vector<2x128xf32>,
    %c0_i32_8 = arith.constant 0 : i32
    %9 = arith.cmpi eq, %arg1, %c0_i32_8 : i32
    %10 = arith.extui %9 : i1 to i32
    %c0_i32_9 = arith.constant 0 : i32
    %11 = arith.cmpi ne, %10, %c0_i32_9 : i32
    scf.if %11 {
      %c0_10 = arith.constant 0 : index
      %c0_11 = arith.constant 0 : index
      %12 = vector.load %arg5[%c0_10, %c0_11] : memref<2x128xf32, #tpu.memory_space<vmem>>, vector<2x128xf32>
      %c0_12 = arith.constant 0 : index
      %c0_13 = arith.constant 0 : index
      %13 = vector.load %arg4[%c0_12, %c0_13] : memref<2x128xf32, #tpu.memory_space<vmem>>, vector<2x128xf32>
      tpu.vector_store %arg4[%c0_12, %c0_13], %12 {strides = array<i32>} : memref<2x128xf32, #tpu.memory_space<vmem>>, vector<2x128xf32>,
    } else {
    }
    return
  }
  func.func @transform_0(%arg0: i32, %arg1: i32) -> (i32, i32) {
    %c0_i32 = arith.constant 0 : i32
    return %arg0, %arg1 : i32, i32
  }
  func.func @transform_1(%arg0: i32, %arg1: i32) -> (i32, i32) {
    %c0_i32 = arith.constant 0 : i32
    %c0_i32_0 = arith.constant 0 : i32
    return %arg1, %c0_i32 : i32, i32
  }
  func.func @transform_2(%arg0: i32, %arg1: i32) -> (i32, i32) {
    %c0_i32 = arith.constant 0 : i32
    %c0_i32_0 = arith.constant 0 : i32
    return %arg0, %c0_i32 : i32, i32
  }
}

</mosaic_0001>

<bundles_post_ra>
// kernel: combo_conv2d_meandim.1
= control target key start
LH: loop header
LB: loop body
LE: loop exit
PB: predicated region body
PF: predicated region fallthrough
CT: control target
= control target key end

     0   :  { %s2235_s0 = inlined_call_operand.vmem [shape: f32[2,3072], index: 0, kind: input, shape index: {}]   ;;  %s2236_s1 = inlined_call_operand.vmem [shape: f32[3072,128], index: 1, kind: input, shape index: {}]   ;;  %s2237_s2 = inlined_call_operand.hbm [shape: f32[2,128], index: 2, kind: output, shape index: {}]  }
   0x1   :  { %v39_v0 = vld [vmem:[%s2236_s1 + $0x78] sm:$0xff]  ;;  %v38_v2 = vld [vmem:[%s2236_s1 + $0x70] sm:$0xff]  ;;  %v37_v6 = vld [vmem:[%s2236_s1 + $0x68] sm:$0xff] }
   0x2   :  { %v71_v1 = vld [vmem:[%s2236_s1 + $0x178] sm:$0xff]  ;;  %469 = vmatpush.msra.mxu0 %v39_v0  ;;  %v70_v4 = vld [vmem:[%s2236_s1 + $0x170] sm:$0xff]  ;;  %v69_v8 = vld [vmem:[%s2236_s1 + $0x168] sm:$0xff] }
   0x3   :  { %509 = vmatpush.msra.mxu2 %v71_v1  ;;  %v55_v3 = vld [vmem:[%s2236_s1 + $0xf8] sm:$0xff]  ;;  %v54_v7 = vld [vmem:[%s2236_s1 + $0xf0] sm:$0xff]  ;;  %v53_v10 = vld [vmem:[%s2236_s1 + $0xe8] sm:$0xff] }
   0x4   :  { %v87_v5 = vld [vmem:[%s2236_s1 + $0x1f8] sm:$0xff]  ;;  %489 = vmatpush.msra.mxu1 %v55_v3  ;;  %470 = vmatpush.msra.mxu0 %v38_v2  ;;  %v86_v9 = vld [vmem:[%s2236_s1 + $0x1f0] sm:$0xff]  ;;  %v36_v11 = vld [vmem:[%s2236_s1 + $0x60] sm:$0xff] }
   0x5   :  { %529 = vmatpush.msra.mxu3 %v87_v5  ;;  %510 = vmatpush.msra.mxu2 %v70_v4  ;;  %v68_v12 = vld [vmem:[%s2236_s1 + $0x160] sm:$0xff]  ;;  %v85_v13 = vld [vmem:[%s2236_s1 + $0x1e8] sm:$0xff]  ;;  %v35_v16 = vld [vmem:[%s2236_s1 + $0x58] sm:$0xff] }
   0x6   :  { %490 = vmatpush.msra.mxu1 %v54_v7  ;;  %471 = vmatpush.msra.mxu0 %v37_v6  ;;  %v52_v14 = vld [vmem:[%s2236_s1 + $0xe0] sm:$0xff]  ;;  %v67_v17 = vld [vmem:[%s2236_s1 + $0x158] sm:$0xff]  ;;  %v34_v20 = vld [vmem:[%s2236_s1 + $0x50] sm:$0xff] }
   0x7   :  { %530 = vmatpush.msra.mxu3 %v86_v9  ;;  %511 = vmatpush.msra.mxu2 %v69_v8  ;;  %v84_v15 = vld [vmem:[%s2236_s1 + $0x1e0] sm:$0xff]  ;;  %v51_v18 = vld [vmem:[%s2236_s1 + $0xd8] sm:$0xff]  ;;  %v66_v21 = vld [vmem:[%s2236_s1 + $0x150] sm:$0xff] }
   0x8   :  { %491 = vmatpush.msra.mxu1 %v53_v10  ;;  %472 = vmatpush.msra.mxu0 %v36_v11  ;;  %v83_v19 = vld [vmem:[%s2236_s1 + $0x1d8] sm:$0xff]  ;;  %v50_v22 = vld [vmem:[%s2236_s1 + $0xd0] sm:$0xff]  ;;  %v33_v24 = vld [vmem:[%s2236_s1 + $0x48] sm:$0xff] }
   0x9   :  { %531 = vmatpush.msra.mxu3 %v85_v13  ;;  %512 = vmatpush.msra.mxu2 %v68_v12  ;;  %v82_v23 = vld [vmem:[%s2236_s1 + $0x1d0] sm:$0xff]  ;;  %v65_v25 = vld [vmem:[%s2236_s1 + $0x148] sm:$0xff]  ;;  %v32_v28 = vld [vmem:[%s2236_s1 + $0x40] sm:$0xff] }
   0xa   :  { %492 = vmatpush.msra.mxu1 %v52_v14  ;;  %473 = vmatpush.msra.mxu0 %v35_v16  ;;  %v49_v26 = vld [vmem:[%s2236_s1 + $0xc8] sm:$0xff]  ;;  %v64_v29 = vld [vmem:[%s2236_s1 + $0x140] sm:$0xff]  ;;  %v31_v32 = vld [vmem:[%s2236_s1 + $0x38] sm:$0xff] }
   0xb   :  { %532 = vmatpush.msra.mxu3 %v84_v15  ;;  %513 = vmatpush.msra.mxu2 %v67_v17  ;;  %v81_v27 = vld [vmem:[%s2236_s1 + $0x1c8] sm:$0xff]  ;;  %v48_v30 = vld [vmem:[%s2236_s1 + $0xc0] sm:$0xff]  ;;  %v63_v33 = vld [vmem:[%s2236_s1 + $0x138] sm:$0xff] }
   0xc   :  { %493 = vmatpush.msra.mxu1 %v51_v18  ;;  %474 = vmatpush.msra.mxu0 %v34_v20  ;;  %v80_v31 = vld [vmem:[%s2236_s1 + $0x1c0] sm:$0xff]  ;;  %v47_v34 = vld [vmem:[%s2236_s1 + $0xb8] sm:$0xff]  ;;  %v30_v36 = vld [vmem:[%s2236_s1 + $0x30] sm:$0xff] }
   0xd   :  { %533 = vmatpush.msra.mxu3 %v83_v19  ;;  %514 = vmatpush.msra.mxu2 %v66_v21  ;;  %v79_v35 = vld [vmem:[%s2236_s1 + $0x1b8] sm:$0xff]  ;;  %v62_v37 = vld [vmem:[%s2236_s1 + $0x130] sm:$0xff]  ;;  %v29_v40 = vld [vmem:[%s2236_s1 + $0x28] sm:$0xff] }
   0xe   :  { %494 = vmatpush.msra.mxu1 %v50_v22  ;;  %475 = vmatpush.msra.mxu0 %v33_v24  ;;  %v46_v38 = vld [vmem:[%s2236_s1 + $0xb0] sm:$0xff]  ;;  %v61_v41 = vld [vmem:[%s2236_s1 + $0x128] sm:$0xff]  ;;  %v28_v44 = vld [vmem:[%s2236_s1 + $0x20] sm:$0xff] }
   0xf   :  { %534 = vmatpush.msra.mxu3 %v82_v23  ;;  %515 = vmatpush.msra.mxu2 %v65_v25  ;;  %v78_v39 = vld [vmem:[%s2236_s1 + $0x1b0] sm:$0xff]  ;;  %v45_v42 = vld [vmem:[%s2236_s1 + $0xa8] sm:$0xff]  ;;  %v60_v45 = vld [vmem:[%s2236_s1 + $0x120] sm:$0xff] }
  0x10   :  { %495 = vmatpush.msra.mxu1 %v49_v26  ;;  %476 = vmatpush.msra.mxu0 %v32_v28  ;;  %v77_v43 = vld [vmem:[%s2236_s1 + $0x1a8] sm:$0xff]  ;;  %v44_v46 = vld [vmem:[%s2236_s1 + $0xa0] sm:$0xff]  ;;  %v27_v48 = vld [vmem:[%s2236_s1 + $0x18] sm:$0xff] }
  0x11   :  { %535 = vmatpush.msra.mxu3 %v81_v27  ;;  %516 = vmatpush.msra.mxu2 %v64_v29  ;;  %v76_v47 = vld [vmem:[%s2236_s1 + $0x1a0] sm:$0xff]  ;;  %v59_v49 = vld [vmem:[%s2236_s1 + $0x118] sm:$0xff]  ;;  %v26_v52 = vld [vmem:[%s2236_s1 + $0x10] sm:$0xff] }
  0x12   :  { %496 = vmatpush.msra.mxu1 %v48_v30  ;;  %477 = vmatpush.msra.mxu0 %v31_v32  ;;  %v43_v50 = vld [vmem:[%s2236_s1 + $0x98] sm:$0xff]  ;;  %v58_v53 = vld [vmem:[%s2236_s1 + $0x110] sm:$0xff]  ;;  %v25_v56 = vld [vmem:[%s2236_s1 + $0x8] sm:$0xff] }
  0x13   :  { %536 = vmatpush.msra.mxu3 %v80_v31  ;;  %517 = vmatpush.msra.mxu2 %v63_v33  ;;  %v75_v51 = vld [vmem:[%s2236_s1 + $0x198] sm:$0xff]  ;;  %v42_v54 = vld [vmem:[%s2236_s1 + $0x90] sm:$0xff]  ;;  %v57_v57 = vld [vmem:[%s2236_s1 + $0x108] sm:$0xff] }
  0x14   :  { %497 = vmatpush.msra.mxu1 %v47_v34  ;;  %478 = vmatpush.msra.mxu0 %v30_v36  ;;  %v74_v55 = vld [vmem:[%s2236_s1 + $0x190] sm:$0xff]  ;;  %v41_v58 = vld [vmem:[%s2236_s1 + $0x88] sm:$0xff]  ;;  %v24_v60 = vld [vmem:[%s2236_s1] sm:$0xff] }
  0x15   :  { %537 = vmatpush.msra.mxu3 %v79_v35  ;;  %518 = vmatpush.msra.mxu2 %v62_v37  ;;  %v73_v59 = vld [vmem:[%s2236_s1 + $0x188] sm:$0xff]  ;;  %v56_v61 = vld [vmem:[%s2236_s1 + $0x100] sm:$0xff]  ;;  %v103_v62 = vld [vmem:[%s2236_s1 + $0x278] sm:$0xff] }
  0x16   :  { %498 = vmatpush.msra.mxu1 %v46_v38  ;;  %479 = vmatpush.msra.mxu0 %v29_v40  ;;  %v135_v63 = vld [vmem:[%s2236_s1 + $0x378] sm:$0xff]  ;;  %v40_v0 = vld [vmem:[%s2236_s1 + $0x80] sm:$0xff]  ;;  %v102_v2 = vld [vmem:[%s2236_s1 + $0x270] sm:$0xff] }
  0x17   :  { %538 = vmatpush.msra.mxu3 %v78_v39  ;;  %519 = vmatpush.msra.mxu2 %v61_v41  ;;  %v72_v1 = vld [vmem:[%s2236_s1 + $0x180] sm:$0xff]  ;;  %v119_v3 = vld [vmem:[%s2236_s1 + $0x2f8] sm:$0xff]  ;;  %v134_v4 = vld [vmem:[%s2236_s1 + $0x370] sm:$0xff] }
  0x18   :  { %499 = vmatpush.msra.mxu1 %v45_v42  ;;  %480 = vmatpush.msra.mxu0 %v28_v44  ;;  %v151_v5 = vld [vmem:[%s2236_s1 + $0x3f8] sm:$0xff]  ;;  %v101_v6 = vld [vmem:[%s2236_s1 + $0x268] sm:$0xff]  ;;  %v118_v7 = vld [vmem:[%s2236_s1 + $0x2f0] sm:$0xff] }
  0x19   :  { %539 = vmatpush.msra.mxu3 %v77_v43  ;;  %520 = vmatpush.msra.mxu2 %v60_v45  ;;  %v133_v8 = vld [vmem:[%s2236_s1 + $0x368] sm:$0xff]  ;;  %v150_v9 = vld [vmem:[%s2236_s1 + $0x3f0] sm:$0xff]  ;;  %v100_v10 = vld [vmem:[%s2236_s1 + $0x260] sm:$0xff] }
  0x1a   :  { %500 = vmatpush.msra.mxu1 %v44_v46  ;;  %481 = vmatpush.msra.mxu0 %v27_v48  ;;  %v117_v11 = vld [vmem:[%s2236_s1 + $0x2e8] sm:$0xff]  ;;  %v132_v12 = vld [vmem:[%s2236_s1 + $0x360] sm:$0xff]  ;;  %v99_v14 = vld [vmem:[%s2236_s1 + $0x258] sm:$0xff] }
  0x1b   :  { %540 = vmatpush.msra.mxu3 %v76_v47  ;;  %521 = vmatpush.msra.mxu2 %v59_v49  ;;  %v149_v13 = vld [vmem:[%s2236_s1 + $0x3e8] sm:$0xff]  ;;  %v116_v15 = vld [vmem:[%s2236_s1 + $0x2e0] sm:$0xff]  ;;  %v131_v16 = vld [vmem:[%s2236_s1 + $0x358] sm:$0xff] }
  0x1c   :  { %501 = vmatpush.msra.mxu1 %v43_v50  ;;  %482 = vmatpush.msra.mxu0 %v26_v52  ;;  %v148_v17 = vld [vmem:[%s2236_s1 + $0x3e0] sm:$0xff]  ;;  %v98_v18 = vld [vmem:[%s2236_s1 + $0x250] sm:$0xff]  ;;  %v115_v19 = vld [vmem:[%s2236_s1 + $0x2d8] sm:$0xff] }
  0x1d   :  { %541 = vmatpush.msra.mxu3 %v75_v51  ;;  %522 = vmatpush.msra.mxu2 %v58_v53  ;;  %v130_v20 = vld [vmem:[%s2236_s1 + $0x350] sm:$0xff]  ;;  %v147_v21 = vld [vmem:[%s2236_s1 + $0x3d8] sm:$0xff]  ;;  %v18_v22 = vld [vmem:[%s2235_s0] sm:$0xff] }
  0x1e   :  { %502 = vmatpush.msra.mxu1 %v42_v54  ;;  %483 = vmatpush.msra.mxu0 %v25_v56  ;;  %v97_v23 = vld [vmem:[%s2236_s1 + $0x248] sm:$0xff]  ;;  %v114_v24 = vld [vmem:[%s2236_s1 + $0x2d0] sm:$0xff]  ;;  %414 = vst [vmem:[#allocation1] ss:$4 sm:$0xff] %v18_v22  ;;  %v96_v27 = vld [vmem:[%s2236_s1 + $0x240] sm:$0xff] }
  0x1f   :  { %542 = vmatpush.msra.mxu3 %v74_v55  ;;  %523 = vmatpush.msra.mxu2 %v57_v57  ;;  %v129_v25 = vld [vmem:[%s2236_s1 + $0x348] sm:$0xff]  ;;  %v146_v26 = vld [vmem:[%s2236_s1 + $0x3d0] sm:$0xff]  ;;  %v128_v29 = vld [vmem:[%s2236_s1 + $0x340] sm:$0xff] }
  0x20   :  { %503 = vmatpush.msra.mxu1 %v41_v58  ;;  %484 = vmatpush.msra.mxu0 %v24_v60  ;;  %v113_v28 = vld [vmem:[%s2236_s1 + $0x2c8] sm:$0xff]  ;;  %v95_v31 = vld [vmem:[%s2236_s1 + $0x238] sm:$0xff]  ;;  %v112_v32 = vld [vmem:[%s2236_s1 + $0x2c0] sm:$0xff] }
  0x21   :  { %543 = vmatpush.msra.mxu3 %v73_v59  ;;  %524 = vmatpush.msra.mxu2 %v56_v61  ;;  %v145_v30 = vld [vmem:[%s2236_s1 + $0x3c8] sm:$0xff]  ;;  %v127_v33 = vld [vmem:[%s2236_s1 + $0x338] sm:$0xff]  ;;  %v144_v34 = vld [vmem:[%s2236_s1 + $0x3c0] sm:$0xff] }
  0x22   :  { %549 = vmatpush.msrb.mxu0 %v103_v62  ;;  %504 = vmatpush.msra.mxu1 %v40_v0  ;;  %v94_v35 = vld [vmem:[%s2236_s1 + $0x230] sm:$0xff]  ;;  %v111_v36 = vld [vmem:[%s2236_s1 + $0x2b8] sm:$0xff]  ;;  %v19_v39 = vld [vmem:[%s2235_s0 + $0x8] sm:$0xff] }
  0x23   :  { %589 = vmatpush.msrb.mxu2 %v135_v63  ;;  %544 = vmatpush.msra.mxu3 %v72_v1  ;;  %v126_v37 = vld [vmem:[%s2236_s1 + $0x330] sm:$0xff]  ;;  %v143_v38 = vld [vmem:[%s2236_s1 + $0x3b8] sm:$0xff]  ;;  %v93_v40 = vld [vmem:[%s2236_s1 + $0x228] sm:$0xff]  ;;  %416 = vst [vmem:[#allocation1 + $0x20] ss:$4 sm:$0xff] %v19_v39 }
  0x24   :  { %550 = vmatpush.msrb.mxu0 %v102_v2  ;;  %569 = vmatpush.msrb.mxu1 %v119_v3  ;;  %v110_v41 = vld [vmem:[%s2236_s1 + $0x2b0] sm:$0xff]  ;;  %v125_v43 = vld [vmem:[%s2236_s1 + $0x328] sm:$0xff]  ;;  %v92_v49 = vld [vmem:[%s2236_s1 + $0x220] sm:$0xff] }
  0x25   :  { %590 = vmatpush.msrb.mxu2 %v134_v4  ;;  %609 = vmatpush.msrb.mxu3 %v151_v5  ;;  %v20_v42 = vld [vmem:[%s2235_s0 + $0x10] sm:$0xff]  ;;  %v1341_v45 = vld.sshfl [vmem:[#allocation1] sm:$0xff pattern:$0x73625140]  ;;  %v109_v50 = vld [vmem:[%s2236_s1 + $0x2a8] sm:$0xff] }
  0x26   :  { %551 = vmatpush.msrb.mxu0 %v101_v6  ;;  %570 = vmatpush.msrb.mxu1 %v118_v7  ;;  %v419_v44 = vld.sshfl [vmem:[#allocation1 + $0x10] sm:$0xff pattern:$0x73625140]  ;;  %v1343_v46 = vld.sshfl [vmem:[#allocation1 + $0x18] sm:$0xff pattern:$0x73625140] }
  0x27   :  { %591 = vmatpush.msrb.mxu2 %v133_v8  ;;  %610 = vmatpush.msrb.mxu3 %v150_v9  ;;  %v1345_v47 = vld.sshfl [vmem:[#allocation1 + $0x8] sm:$0xff pattern:$0x73625140]  ;;  %v142_v48 = vld [vmem:[%s2236_s1 + $0x3b0] sm:$0xff]  ;;  %v124_v51 = vld [vmem:[%s2236_s1 + $0x320] sm:$0xff] }
  0x28   :  { %552 = vmatpush.msrb.mxu0 %v100_v10  ;;  %571 = vmatpush.msrb.mxu1 %v117_v11  ;;  %425 = vst [vmem:[#allocation1] ss:$4 sm:$0xff] %v20_v42  ;;  %v141_v52 = vld [vmem:[%s2236_s1 + $0x3a8] sm:$0xff]  ;;  %v91_v53 = vld [vmem:[%s2236_s1 + $0x218] sm:$0xff]  ;;  %v108_v54 = vld [vmem:[%s2236_s1 + $0x2a0] sm:$0xff] }
  0x29   :  { %592 = vmatpush.msrb.mxu2 %v132_v12  ;;  %611 = vmatpush.msrb.mxu3 %v149_v13  ;;  %v123_v55 = vld [vmem:[%s2236_s1 + $0x318] sm:$0xff]  ;;  %v140_v56 = vld [vmem:[%s2236_s1 + $0x3a0] sm:$0xff]  ;;  %v90_v57 = vld [vmem:[%s2236_s1 + $0x210] sm:$0xff] }
  0x2a   :  { %553 = vmatpush.msrb.mxu0 %v99_v14  ;;  %572 = vmatpush.msrb.mxu1 %v116_v15  ;;  %v107_v58 = vld [vmem:[%s2236_s1 + $0x298] sm:$0xff]  ;;  %v1383_v60 = vld.sshfl [vmem:[#allocation1 + $0x30] sm:$0xff pattern:$0x73625140]  ;;  %v89_v2 = vld [vmem:[%s2236_s1 + $0x208] sm:$0xff] }
  0x2b   :  { %593 = vmatpush.msrb.mxu2 %v131_v16  ;;  %612 = vmatpush.msrb.mxu3 %v148_v17  ;;  %v21_v59 = vld [vmem:[%s2235_s0 + $0x18] sm:$0xff]  ;;  %v1385_v61 = vld.sshfl [vmem:[#allocation1 + $0x20] sm:$0xff pattern:$0x73625140]  ;;  %v122_v0 = vld [vmem:[%s2236_s1 + $0x310] sm:$0xff] }
  0x2c   :  { %554 = vmatpush.msrb.mxu0 %v98_v18  ;;  %573 = vmatpush.msrb.mxu1 %v115_v19  ;;  %v1387_v62 = vld.sshfl [vmem:[#allocation1 + $0x38] sm:$0xff pattern:$0x73625140]  ;;  %v1389_v63 = vld.sshfl [vmem:[#allocation1 + $0x28] sm:$0xff pattern:$0x73625140] }
  0x2d   :  { %594 = vmatpush.msrb.mxu2 %v130_v20  ;;  %613 = vmatpush.msrb.mxu3 %v147_v21  ;;  %v139_v1 = vld [vmem:[%s2236_s1 + $0x398] sm:$0xff]  ;;  %426 = vst [vmem:[#allocation1 + $0x20] ss:$4 sm:$0xff] %v21_v59  ;;  %v106_v3 = vld [vmem:[%s2236_s1 + $0x290] sm:$0xff]  ;;  %v121_v4 = vld [vmem:[%s2236_s1 + $0x308] sm:$0xff] }
  0x2e   :  { %555 = vmatpush.msrb.mxu0 %v97_v23  ;;  %574 = vmatpush.msrb.mxu1 %v114_v24  ;;  %v138_v5 = vld [vmem:[%s2236_s1 + $0x390] sm:$0xff]  ;;  %v88_v6 = vld [vmem:[%s2236_s1 + $0x200] sm:$0xff]  ;;  %v105_v7 = vld [vmem:[%s2236_s1 + $0x288] sm:$0xff] }
  0x2f   :  { %595 = vmatpush.msrb.mxu2 %v129_v25  ;;  %614 = vmatpush.msrb.mxu3 %v146_v26  ;;  %v120_v8 = vld [vmem:[%s2236_s1 + $0x300] sm:$0xff]  ;;  %v137_v9 = vld [vmem:[%s2236_s1 + $0x388] sm:$0xff]  ;;  %v167_v10 = vld [vmem:[%s2236_s1 + $0x478] sm:$0xff] }
  0x30   :  { %556 = vmatpush.msrb.mxu0 %v96_v27  ;;  %575 = vmatpush.msrb.mxu1 %v113_v28  ;;  %v199_v11 = vld [vmem:[%s2236_s1 + $0x578] sm:$0xff]  ;;  %v104_v12 = vld [vmem:[%s2236_s1 + $0x280] sm:$0xff]  ;;  %v166_v14 = vld [vmem:[%s2236_s1 + $0x470] sm:$0xff] }
  0x31   :  { %596 = vmatpush.msrb.mxu2 %v128_v29  ;;  %615 = vmatpush.msrb.mxu3 %v145_v30  ;;  %v136_v13 = vld [vmem:[%s2236_s1 + $0x380] sm:$0xff]  ;;  %v183_v15 = vld [vmem:[%s2236_s1 + $0x4f8] sm:$0xff]  ;;  %v198_v16 = vld [vmem:[%s2236_s1 + $0x570] sm:$0xff] }
  0x32   :  { %557 = vmatpush.msrb.mxu0 %v95_v31  ;;  %576 = vmatpush.msrb.mxu1 %v112_v32  ;;  %v215_v17 = vld [vmem:[%s2236_s1 + $0x5f8] sm:$0xff]  ;;  %v165_v18 = vld [vmem:[%s2236_s1 + $0x468] sm:$0xff]  ;;  %v182_v19 = vld [vmem:[%s2236_s1 + $0x4f0] sm:$0xff] }
  0x33   :  { %597 = vmatpush.msrb.mxu2 %v127_v33  ;;  %616 = vmatpush.msrb.mxu3 %v144_v34  ;;  %v197_v20 = vld [vmem:[%s2236_s1 + $0x568] sm:$0xff]  ;;  %v214_v21 = vld [vmem:[%s2236_s1 + $0x5f0] sm:$0xff]  ;;  %v164_v22 = vld [vmem:[%s2236_s1 + $0x460] sm:$0xff] }
  0x34   :  { %558 = vmatpush.msrb.mxu0 %v94_v35  ;;  %577 = vmatpush.msrb.mxu1 %v111_v36  ;;  %v181_v23 = vld [vmem:[%s2236_s1 + $0x4e8] sm:$0xff]  ;;  %v196_v24 = vld [vmem:[%s2236_s1 + $0x560] sm:$0xff]  ;;  %v1471_v26 = vld.sshfl [vmem:[#allocation1 + $0x10] sm:$0xff pattern:$0x73625140] }
  0x35   :  { %598 = vmatpush.msrb.mxu2 %v126_v37  ;;  %617 = vmatpush.msrb.mxu3 %v143_v38  ;;  %v1469_v25 = vld.sshfl [vmem:[#allocation1] sm:$0xff pattern:$0x73625140]  ;;  %v1473_v27 = vld.sshfl [vmem:[#allocation1 + $0x8] sm:$0xff pattern:$0x73625140] }
  0x36   :  { %559 = vmatpush.msrb.mxu0 %v93_v40  ;;  %578 = vmatpush.msrb.mxu1 %v110_v41  ;;  %v213_v28 = vld [vmem:[%s2236_s1 + $0x5e8] sm:$0xff]  ;;  %v22_v29 = vld [vmem:[%s2235_s0 + $0x20] sm:$0xff]  ;;  %v1481_v30 = vld.sshfl [vmem:[#allocation1 + $0x18] sm:$0xff pattern:$0x73625140] }
  0x37   :  { %599 = vmatpush.msrb.mxu2 %v125_v43  ;;  %618 = vmatpush.msrb.mxu3 %v142_v48  ;;  %v163_v31 = vld [vmem:[%s2236_s1 + $0x458] sm:$0xff]  ;;  %435 = vst [vmem:[#allocation1] ss:$4 sm:$0xff] %v22_v29  ;;  %v180_v32 = vld [vmem:[%s2236_s1 + $0x4e0] sm:$0xff] }
  0x38   :  { %560 = vmatpush.msrb.mxu0 %v92_v49  ;;  %579 = vmatpush.msrb.mxu1 %v109_v50  ;;  %v195_v33 = vld [vmem:[%s2236_s1 + $0x558] sm:$0xff] }
  0x39   :  { %600 = vmatpush.msrb.mxu2 %v124_v51  ;;  %619 = vmatpush.msrb.mxu3 %v141_v52 }
  0x3a   :  { %561 = vmatpush.msrb.mxu0 %v91_v53  ;;  %580 = vmatpush.msrb.mxu1 %v108_v54 }
  0x3b   :  { %601 = vmatpush.msrb.mxu2 %v123_v55  ;;  %620 = vmatpush.msrb.mxu3 %v140_v56 }
  0x3c   :  { %562 = vmatpush.msrb.mxu0 %v90_v57  ;;  %581 = vmatpush.msrb.mxu1 %v107_v58 }
  0x3d   :  { %602 = vmatpush.msrb.mxu2 %v122_v0  ;;  %621 = vmatpush.msrb.mxu3 %v139_v1 }
  0x3e   :  { %563 = vmatpush.msrb.mxu0 %v89_v2  ;;  %582 = vmatpush.msrb.mxu1 %v106_v3 }
  0x3f   :  { %603 = vmatpush.msrb.mxu2 %v121_v4  ;;  %622 = vmatpush.msrb.mxu3 %v138_v5 }
  0x40   :  { %525 = vmatmul.f32.vlgmr.msra.gmra.mxu2 %v419_v44  ;;  %564 = vmatpush.msrb.mxu0 %v88_v6 }
  0x41   :  { %583 = vmatpush.msrb.mxu1 %v105_v7  ;;  %604 = vmatpush.msrb.mxu2 %v120_v8 }
  0x42   :  { %623 = vmatpush.msrb.mxu3 %v137_v9  ;;  %485 = vmatmul.f32.vlgmr.msra.gmra.mxu0 %v1341_v45 }
  0x43   :  { %545 = vmatmul.f32.vlgmr.msra.gmra.mxu3 %v1343_v46  ;;  %629 = vmatpush.msra.mxu0 %v167_v10 }
  0x44   :  { %669 = vmatpush.msra.mxu2 %v199_v11  ;;  %584 = vmatpush.msrb.mxu1 %v104_v12 }
  0x45   :  { %624 = vmatpush.msrb.mxu3 %v136_v13  ;;  %505 = vmatmul.f32.vlgmr.msra.gmra.mxu1 %v1345_v47 }
  0x46   :  { %630 = vmatpush.msra.mxu0 %v166_v14  ;;  %649 = vmatpush.msra.mxu1 %v183_v15 }
  0x47   :  { %670 = vmatpush.msra.mxu2 %v198_v16  ;;  %689 = vmatpush.msra.mxu3 %v215_v17 }
  0x48   :  { %631 = vmatpush.msra.mxu0 %v165_v18  ;;  %650 = vmatpush.msra.mxu1 %v182_v19 }
  0x49   :  { %671 = vmatpush.msra.mxu2 %v197_v20  ;;  %690 = vmatpush.msra.mxu3 %v214_v21 }
  0x4a   :  { %605 = vmatmul.f32.vlgmr.msrb.gmra.mxu2 %v1383_v60  ;;  %632 = vmatpush.msra.mxu0 %v164_v22 }
  0x4b   :  { %651 = vmatpush.msra.mxu1 %v181_v23  ;;  %672 = vmatpush.msra.mxu2 %v196_v24 }
  0x4c   :  { %7 = vsyncpa [#allocation4], 0  ;;  %691 = vmatpush.msra.mxu3 %v213_v28  ;;  %565 = vmatmul.f32.vlgmr.msrb.gmra.mxu0 %v1385_v61  ;;  %v212_v34 = vld [vmem:[%s2236_s1 + $0x5e0] sm:$0xff]  ;;  %v162_v35 = vld [vmem:[%s2236_s1 + $0x450] sm:$0xff]  ;;  %s963_s23 = sshll.u32 %s2237_s2, 4  ;;  %s964_s23 = int_to_ptr.hbm [resolvable:$true] %s963_s23 }
  0x4d   :  { %625 = vmatmul.f32.vlgmr.msrb.gmra.mxu3 %v1387_v62  ;;  %633 = vmatpush.msra.mxu0 %v163_v31  ;;  %v179_v36 = vld [vmem:[%s2236_s1 + $0x4d8] sm:$0xff]  ;;  %v194_v37 = vld [vmem:[%s2236_s1 + $0x550] sm:$0xff]  ;;  %v161_v39 = vld [vmem:[%s2236_s1 + $0x448] sm:$0xff] }
  0x4e   :  { %652 = vmatpush.msra.mxu1 %v180_v32  ;;  %673 = vmatpush.msra.mxu2 %v195_v33  ;;  %v211_v38 = vld [vmem:[%s2236_s1 + $0x5d8] sm:$0xff]  ;;  %v178_v40 = vld [vmem:[%s2236_s1 + $0x4d0] sm:$0xff]  ;;  %v193_v41 = vld [vmem:[%s2236_s1 + $0x548] sm:$0xff] }
  0x4f   :  { %692 = vmatpush.msra.mxu3 %v212_v34  ;;  %585 = vmatmul.f32.vlgmr.msrb.gmra.mxu1 %v1389_v63  ;;  %v210_v42 = vld [vmem:[%s2236_s1 + $0x5d0] sm:$0xff]  ;;  %v160_v43 = vld [vmem:[%s2236_s1 + $0x440] sm:$0xff]  ;;  %v177_v44 = vld [vmem:[%s2236_s1 + $0x4c8] sm:$0xff] }
  0x50   :  { %634 = vmatpush.msra.mxu0 %v162_v35  ;;  %653 = vmatpush.msra.mxu1 %v179_v36  ;;  %v192_v45 = vld [vmem:[%s2236_s1 + $0x540] sm:$0xff]  ;;  %v209_v46 = vld [vmem:[%s2236_s1 + $0x5c8] sm:$0xff]  ;;  %v159_v47 = vld [vmem:[%s2236_s1 + $0x438] sm:$0xff] }
  0x51   :  { %674 = vmatpush.msra.mxu2 %v194_v37  ;;  %693 = vmatpush.msra.mxu3 %v211_v38  ;;  %v176_v48 = vld [vmem:[%s2236_s1 + $0x4c0] sm:$0xff]  ;;  %v191_v49 = vld [vmem:[%s2236_s1 + $0x538] sm:$0xff]  ;;  %v158_v51 = vld [vmem:[%s2236_s1 + $0x430] sm:$0xff] }
  0x52   :  { %635 = vmatpush.msra.mxu0 %v161_v39  ;;  %654 = vmatpush.msra.mxu1 %v178_v40  ;;  %v208_v50 = vld [vmem:[%s2236_s1 + $0x5c0] sm:$0xff]  ;;  %v175_v52 = vld [vmem:[%s2236_s1 + $0x4b8] sm:$0xff]  ;;  %v190_v53 = vld [vmem:[%s2236_s1 + $0x530] sm:$0xff] }
  0x53   :  { %675 = vmatpush.msra.mxu2 %v193_v41  ;;  %694 = vmatpush.msra.mxu3 %v210_v42  ;;  %v207_v54 = vld [vmem:[%s2236_s1 + $0x5b8] sm:$0xff]  ;;  %v157_v55 = vld [vmem:[%s2236_s1 + $0x428] sm:$0xff]  ;;  %v174_v56 = vld [vmem:[%s2236_s1 + $0x4b0] sm:$0xff] }
  0x54   :  { %636 = vmatpush.msra.mxu0 %v160_v43  ;;  %655 = vmatpush.msra.mxu1 %v177_v44  ;;  %v189_v57 = vld [vmem:[%s2236_s1 + $0x528] sm:$0xff]  ;;  %v206_v58 = vld [vmem:[%s2236_s1 + $0x5b0] sm:$0xff]  ;;  %v156_v59 = vld [vmem:[%s2236_s1 + $0x420] sm:$0xff] }
  0x55   :  { %676 = vmatpush.msra.mxu2 %v192_v45  ;;  %695 = vmatpush.msra.mxu3 %v209_v46  ;;  %v173_v60 = vld [vmem:[%s2236_s1 + $0x4a8] sm:$0xff]  ;;  %v188_v61 = vld [vmem:[%s2236_s1 + $0x520] sm:$0xff]  ;;  %v155_v63 = vld [vmem:[%s2236_s1 + $0x418] sm:$0xff] }
  0x56   :  { %637 = vmatpush.msra.mxu0 %v159_v47  ;;  %656 = vmatpush.msra.mxu1 %v176_v48  ;;  %v205_v62 = vld [vmem:[%s2236_s1 + $0x5a8] sm:$0xff]  ;;  %v172_v0 = vld [vmem:[%s2236_s1 + $0x4a0] sm:$0xff]  ;;  %v187_v1 = vld [vmem:[%s2236_s1 + $0x518] sm:$0xff] }
  0x57   :  { %677 = vmatpush.msra.mxu2 %v191_v49  ;;  %696 = vmatpush.msra.mxu3 %v208_v50  ;;  %v204_v2 = vld [vmem:[%s2236_s1 + $0x5a0] sm:$0xff]  ;;  %v154_v3 = vld [vmem:[%s2236_s1 + $0x410] sm:$0xff]  ;;  %v171_v4 = vld [vmem:[%s2236_s1 + $0x498] sm:$0xff] }
  0x58   :  { %638 = vmatpush.msra.mxu0 %v158_v51  ;;  %657 = vmatpush.msra.mxu1 %v175_v52  ;;  %v186_v5 = vld [vmem:[%s2236_s1 + $0x510] sm:$0xff]  ;;  %v203_v6 = vld [vmem:[%s2236_s1 + $0x598] sm:$0xff]  ;;  %v153_v7 = vld [vmem:[%s2236_s1 + $0x408] sm:$0xff] }
  0x59   :  { %678 = vmatpush.msra.mxu2 %v190_v53  ;;  %697 = vmatpush.msra.mxu3 %v207_v54  ;;  %v170_v8 = vld [vmem:[%s2236_s1 + $0x490] sm:$0xff]  ;;  %v185_v9 = vld [vmem:[%s2236_s1 + $0x508] sm:$0xff]  ;;  %v152_v11 = vld [vmem:[%s2236_s1 + $0x400] sm:$0xff] }
  0x5a   :  { %639 = vmatpush.msra.mxu0 %v157_v55  ;;  %658 = vmatpush.msra.mxu1 %v174_v56  ;;  %v202_v10 = vld [vmem:[%s2236_s1 + $0x590] sm:$0xff]  ;;  %v169_v12 = vld [vmem:[%s2236_s1 + $0x488] sm:$0xff]  ;;  %v184_v13 = vld [vmem:[%s2236_s1 + $0x500] sm:$0xff] }
  0x5b   :  { %679 = vmatpush.msra.mxu2 %v189_v57  ;;  %698 = vmatpush.msra.mxu3 %v206_v58  ;;  %v201_v14 = vld [vmem:[%s2236_s1 + $0x588] sm:$0xff]  ;;  %v231_v15 = vld [vmem:[%s2236_s1 + $0x678] sm:$0xff]  ;;  %v168_v17 = vld [vmem:[%s2236_s1 + $0x480] sm:$0xff] }
  0x5c   :  { %640 = vmatpush.msra.mxu0 %v156_v59  ;;  %659 = vmatpush.msra.mxu1 %v173_v60  ;;  %v263_v16 = vld [vmem:[%s2236_s1 + $0x778] sm:$0xff]  ;;  %v200_v18 = vld [vmem:[%s2236_s1 + $0x580] sm:$0xff]  ;;  %v230_v19 = vld [vmem:[%s2236_s1 + $0x670] sm:$0xff] }
  0x5d   :  { %680 = vmatpush.msra.mxu2 %v188_v61  ;;  %699 = vmatpush.msra.mxu3 %v205_v62  ;;  %v247_v20 = vld [vmem:[%s2236_s1 + $0x6f8] sm:$0xff]  ;;  %v262_v21 = vld [vmem:[%s2236_s1 + $0x770] sm:$0xff]  ;;  %v229_v23 = vld [vmem:[%s2236_s1 + $0x668] sm:$0xff] }
  0x5e   :  { %641 = vmatpush.msra.mxu0 %v155_v63  ;;  %660 = vmatpush.msra.mxu1 %v172_v0  ;;  %v279_v22 = vld [vmem:[%s2236_s1 + $0x7f8] sm:$0xff]  ;;  %v246_v24 = vld [vmem:[%s2236_s1 + $0x6f0] sm:$0xff]  ;;  %v228_v28 = vld [vmem:[%s2236_s1 + $0x660] sm:$0xff] }
  0x5f   :  { %681 = vmatpush.msra.mxu2 %v187_v1  ;;  %700 = vmatpush.msra.mxu3 %v204_v2  ;;  %v1674_v29 = vld.sshfl [vmem:[#allocation1 + $0x20] sm:$0xff pattern:$0x73625140]  ;;  %v1676_v31 = vld.sshfl [vmem:[#allocation1 + $0x30] sm:$0xff pattern:$0x73625140] }
  0x60   :  { %642 = vmatpush.msra.mxu0 %v154_v3  ;;  %661 = vmatpush.msra.mxu1 %v171_v4  ;;  %v1678_v32 = vld.sshfl [vmem:[#allocation1 + $0x28] sm:$0xff pattern:$0x73625140]  ;;  %v1686_v33 = vld.sshfl [vmem:[#allocation1 + $0x38] sm:$0xff pattern:$0x73625140] }
  0x61   :  { %682 = vmatpush.msra.mxu2 %v186_v5  ;;  %701 = vmatpush.msra.mxu3 %v203_v6  ;;  %v260_v34 = vld [vmem:[%s2236_s1 + $0x760] sm:$0xff]  ;;  %v277_v35 = vld [vmem:[%s2236_s1 + $0x7e8] sm:$0xff]  ;;  %v227_v36 = vld [vmem:[%s2236_s1 + $0x658] sm:$0xff] }
  0x62   :  { %643 = vmatpush.msra.mxu0 %v153_v7  ;;  %662 = vmatpush.msra.mxu1 %v170_v8  ;;  %v244_v37 = vld [vmem:[%s2236_s1 + $0x6e0] sm:$0xff]  ;;  %v259_v38 = vld [vmem:[%s2236_s1 + $0x758] sm:$0xff]  ;;  %v226_v40 = vld [vmem:[%s2236_s1 + $0x650] sm:$0xff] }
  0x63   :  { %683 = vmatpush.msra.mxu2 %v185_v9  ;;  %702 = vmatpush.msra.mxu3 %v202_v10  ;;  %v276_v39 = vld [vmem:[%s2236_s1 + $0x7e0] sm:$0xff]  ;;  %v243_v41 = vld [vmem:[%s2236_s1 + $0x6d8] sm:$0xff]  ;;  %v258_v42 = vld [vmem:[%s2236_s1 + $0x750] sm:$0xff] }
  0x64   :  { %644 = vmatpush.msra.mxu0 %v152_v11  ;;  %663 = vmatpush.msra.mxu1 %v169_v12  ;;  %v275_v43 = vld [vmem:[%s2236_s1 + $0x7d8] sm:$0xff]  ;;  %v225_v44 = vld [vmem:[%s2236_s1 + $0x648] sm:$0xff]  ;;  %v242_v45 = vld [vmem:[%s2236_s1 + $0x6d0] sm:$0xff] }
  0x65   :  { %684 = vmatpush.msra.mxu2 %v184_v13  ;;  %703 = vmatpush.msra.mxu3 %v201_v14  ;;  %v257_v46 = vld [vmem:[%s2236_s1 + $0x748] sm:$0xff]  ;;  %v274_v47 = vld [vmem:[%s2236_s1 + $0x7d0] sm:$0xff]  ;;  %v224_v48 = vld [vmem:[%s2236_s1 + $0x640] sm:$0xff] }
  0x66   :  { %645 = vmatmul.f32.vlgmr.msra.gmra.mxu0 %v1469_v25  ;;  %685 = vmatmul.f32.vlgmr.msra.gmra.mxu2 %v1471_v26  ;;  %v261_v25 = vld [vmem:[%s2236_s1 + $0x768] sm:$0xff]  ;;  %v278_v26 = vld [vmem:[%s2236_s1 + $0x7f0] sm:$0xff]  ;;  %v256_v50 = vld [vmem:[%s2236_s1 + $0x740] sm:$0xff] }
  0x67   :  { %709 = vmatpush.msrb.mxu0 %v231_v15  ;;  %749 = vmatpush.msrb.mxu2 %v263_v16  ;;  %v241_v49 = vld [vmem:[%s2236_s1 + $0x6c8] sm:$0xff]  ;;  %v223_v52 = vld [vmem:[%s2236_s1 + $0x638] sm:$0xff]  ;;  %v240_v53 = vld [vmem:[%s2236_s1 + $0x6c0] sm:$0xff] }
  0x68   :  { %664 = vmatpush.msra.mxu1 %v168_v17  ;;  %704 = vmatpush.msra.mxu3 %v200_v18  ;;  %v273_v51 = vld [vmem:[%s2236_s1 + $0x7c8] sm:$0xff]  ;;  %v255_v54 = vld [vmem:[%s2236_s1 + $0x738] sm:$0xff]  ;;  %v272_v55 = vld [vmem:[%s2236_s1 + $0x7c0] sm:$0xff] }
  0x69   :  { %665 = vmatmul.f32.vlgmr.msra.gmra.mxu1 %v1473_v27  ;;  %705 = vmatmul.f32.vlgmr.msra.gmra.mxu3 %v1481_v30  ;;  %v245_v27 = vld [vmem:[%s2236_s1 + $0x6e8] sm:$0xff]  ;;  %v222_v56 = vld [vmem:[%s2236_s1 + $0x630] sm:$0xff]  ;;  %v239_v57 = vld [vmem:[%s2236_s1 + $0x6b8] sm:$0xff] }
  0x6a   :  { %710 = vmatpush.msrb.mxu0 %v230_v19  ;;  %729 = vmatpush.msrb.mxu1 %v247_v20  ;;  %v23_v30 = vld [vmem:[%s2235_s0 + $0x28] sm:$0xff]  ;;  %v254_v58 = vld [vmem:[%s2236_s1 + $0x730] sm:$0xff]  ;;  %v271_v59 = vld [vmem:[%s2236_s1 + $0x7b8] sm:$0xff] }
  0x6b   :  { %750 = vmatpush.msrb.mxu2 %v262_v21  ;;  %769 = vmatpush.msrb.mxu3 %v279_v22  ;;  %436 = vst [vmem:[#allocation1 + $0x20] ss:$4 sm:$0xff] %v23_v30  ;;  %v221_v60 = vld [vmem:[%s2236_s1 + $0x628] sm:$0xff]  ;;  %v238_v61 = vld [vmem:[%s2236_s1 + $0x6b0] sm:$0xff]  ;;  %v220_v0 = vld [vmem:[%s2236_s1 + $0x620] sm:$0xff] }
  0x6c   :  { %711 = vmatpush.msrb.mxu0 %v229_v23  ;;  %730 = vmatpush.msrb.mxu1 %v246_v24  ;;  %v253_v62 = vld [vmem:[%s2236_s1 + $0x728] sm:$0xff]  ;;  %v270_v63 = vld [vmem:[%s2236_s1 + $0x7b0] sm:$0xff]  ;;  %v252_v2 = vld [vmem:[%s2236_s1 + $0x720] sm:$0xff] }
  0x6d   :  { %751 = vmatpush.msrb.mxu2 %v261_v25  ;;  %770 = vmatpush.msrb.mxu3 %v278_v26  ;;  %v237_v1 = vld [vmem:[%s2236_s1 + $0x6a8] sm:$0xff]  ;;  %v219_v4 = vld [vmem:[%s2236_s1 + $0x618] sm:$0xff]  ;;  %v236_v5 = vld [vmem:[%s2236_s1 + $0x6a0] sm:$0xff] }
  0x6e   :  { %712 = vmatpush.msrb.mxu0 %v228_v28  ;;  %731 = vmatpush.msrb.mxu1 %v245_v27  ;;  %v269_v3 = vld [vmem:[%s2236_s1 + $0x7a8] sm:$0xff]  ;;  %v251_v6 = vld [vmem:[%s2236_s1 + $0x718] sm:$0xff]  ;;  %v268_v7 = vld [vmem:[%s2236_s1 + $0x7a0] sm:$0xff] }
  0x6f   :  { %752 = vmatpush.msrb.mxu2 %v260_v34  ;;  %771 = vmatpush.msrb.mxu3 %v277_v35  ;;  %v218_v8 = vld [vmem:[%s2236_s1 + $0x610] sm:$0xff]  ;;  %v235_v9 = vld [vmem:[%s2236_s1 + $0x698] sm:$0xff]  ;;  %v217_v12 = vld [vmem:[%s2236_s1 + $0x608] sm:$0xff] }
  0x70   :  { %713 = vmatpush.msrb.mxu0 %v227_v36  ;;  %732 = vmatpush.msrb.mxu1 %v244_v37  ;;  %v250_v10 = vld [vmem:[%s2236_s1 + $0x710] sm:$0xff]  ;;  %v267_v11 = vld [vmem:[%s2236_s1 + $0x798] sm:$0xff]  ;;  %v249_v14 = vld [vmem:[%s2236_s1 + $0x708] sm:$0xff] }
  0x71   :  { %753 = vmatpush.msrb.mxu2 %v259_v38  ;;  %772 = vmatpush.msrb.mxu3 %v276_v39  ;;  %v234_v13 = vld [vmem:[%s2236_s1 + $0x690] sm:$0xff]  ;;  %v216_v16 = vld [vmem:[%s2236_s1 + $0x600] sm:$0xff]  ;;  %v233_v17 = vld [vmem:[%s2236_s1 + $0x688] sm:$0xff] }
  0x72   :  { %714 = vmatpush.msrb.mxu0 %v226_v40  ;;  %733 = vmatpush.msrb.mxu1 %v243_v41  ;;  %v266_v15 = vld [vmem:[%s2236_s1 + $0x790] sm:$0xff]  ;;  %v248_v18 = vld [vmem:[%s2236_s1 + $0x700] sm:$0xff]  ;;  %v265_v19 = vld [vmem:[%s2236_s1 + $0x788] sm:$0xff] }
  0x73   :  { %754 = vmatpush.msrb.mxu2 %v258_v42  ;;  %773 = vmatpush.msrb.mxu3 %v275_v43  ;;  %v295_v20 = vld [vmem:[%s2236_s1 + $0x878] sm:$0xff]  ;;  %v232_v22 = vld [vmem:[%s2236_s1 + $0x680] sm:$0xff]  ;;  %v294_v24 = vld [vmem:[%s2236_s1 + $0x870] sm:$0xff] }
  0x74   :  { %715 = vmatpush.msrb.mxu0 %v225_v44  ;;  %734 = vmatpush.msrb.mxu1 %v242_v45  ;;  %v327_v21 = vld [vmem:[%s2236_s1 + $0x978] sm:$0xff]  ;;  %v264_v23 = vld [vmem:[%s2236_s1 + $0x780] sm:$0xff]  ;;  %v326_v26 = vld [vmem:[%s2236_s1 + $0x970] sm:$0xff] }
  0x75   :  { %755 = vmatpush.msrb.mxu2 %v257_v46  ;;  %774 = vmatpush.msrb.mxu3 %v274_v47  ;;  %v311_v25 = vld [vmem:[%s2236_s1 + $0x8f8] sm:$0xff]  ;;  %v325_v27 = vld [vmem:[%s2236_s1 + $0x968] sm:$0xff]  ;;  %v292_v30 = vld [vmem:[%s2236_s1 + $0x860] sm:$0xff] }
  0x76   :  { %716 = vmatpush.msrb.mxu0 %v224_v48  ;;  %735 = vmatpush.msrb.mxu1 %v241_v49  ;;  %v343_v28 = vld [vmem:[%s2236_s1 + $0x9f8] sm:$0xff]  ;;  %v324_v34 = vld [vmem:[%s2236_s1 + $0x960] sm:$0xff]  ;;  %v341_v35 = vld [vmem:[%s2236_s1 + $0x9e8] sm:$0xff] }
  0x77   :  { %756 = vmatpush.msrb.mxu2 %v256_v50  ;;  %775 = vmatpush.msrb.mxu3 %v273_v51  ;;  %v291_v36 = vld [vmem:[%s2236_s1 + $0x858] sm:$0xff]  ;;  %v308_v37 = vld [vmem:[%s2236_s1 + $0x8e0] sm:$0xff]  ;;  %v290_v40 = vld [vmem:[%s2236_s1 + $0x850] sm:$0xff] }
  0x78   :  { %717 = vmatpush.msrb.mxu0 %v223_v52  ;;  %736 = vmatpush.msrb.mxu1 %v240_v53  ;;  %v323_v38 = vld [vmem:[%s2236_s1 + $0x958] sm:$0xff]  ;;  %v340_v39 = vld [vmem:[%s2236_s1 + $0x9e0] sm:$0xff]  ;;  %v322_v42 = vld [vmem:[%s2236_s1 + $0x950] sm:$0xff] }
  0x79   :  { %757 = vmatpush.msrb.mxu2 %v255_v54  ;;  %776 = vmatpush.msrb.mxu3 %v272_v55  ;;  %v307_v41 = vld [vmem:[%s2236_s1 + $0x8d8] sm:$0xff]  ;;  %v289_v44 = vld [vmem:[%s2236_s1 + $0x848] sm:$0xff]  ;;  %v306_v45 = vld [vmem:[%s2236_s1 + $0x8d0] sm:$0xff] }
  0x7a   :  { %718 = vmatpush.msrb.mxu0 %v222_v56  ;;  %737 = vmatpush.msrb.mxu1 %v239_v57  ;;  %v339_v43 = vld [vmem:[%s2236_s1 + $0x9d8] sm:$0xff]  ;;  %v321_v46 = vld [vmem:[%s2236_s1 + $0x948] sm:$0xff]  ;;  %v338_v47 = vld [vmem:[%s2236_s1 + $0x9d0] sm:$0xff] }
  0x7b   :  { %758 = vmatpush.msrb.mxu2 %v254_v58  ;;  %777 = vmatpush.msrb.mxu3 %v271_v59  ;;  %v288_v48 = vld [vmem:[%s2236_s1 + $0x840] sm:$0xff]  ;;  %v305_v49 = vld [vmem:[%s2236_s1 + $0x8c8] sm:$0xff]  ;;  %v287_v52 = vld [vmem:[%s2236_s1 + $0x838] sm:$0xff] }
  0x7c   :  { %719 = vmatpush.msrb.mxu0 %v221_v60  ;;  %738 = vmatpush.msrb.mxu1 %v238_v61  ;;  %v320_v50 = vld [vmem:[%s2236_s1 + $0x940] sm:$0xff]  ;;  %v337_v51 = vld [vmem:[%s2236_s1 + $0x9c8] sm:$0xff]  ;;  %v319_v54 = vld [vmem:[%s2236_s1 + $0x938] sm:$0xff] }
  0x7d   :  { %759 = vmatpush.msrb.mxu2 %v253_v62  ;;  %778 = vmatpush.msrb.mxu3 %v270_v63  ;;  %v304_v53 = vld [vmem:[%s2236_s1 + $0x8c0] sm:$0xff]  ;;  %v286_v56 = vld [vmem:[%s2236_s1 + $0x830] sm:$0xff]  ;;  %v303_v57 = vld [vmem:[%s2236_s1 + $0x8b8] sm:$0xff] }
  0x7e   :  { %720 = vmatpush.msrb.mxu0 %v220_v0  ;;  %739 = vmatpush.msrb.mxu1 %v237_v1  ;;  %v336_v55 = vld [vmem:[%s2236_s1 + $0x9c0] sm:$0xff]  ;;  %v318_v58 = vld [vmem:[%s2236_s1 + $0x930] sm:$0xff]  ;;  %v335_v59 = vld [vmem:[%s2236_s1 + $0x9b8] sm:$0xff] }
  0x7f   :  { %760 = vmatpush.msrb.mxu2 %v252_v2  ;;  %779 = vmatpush.msrb.mxu3 %v269_v3  ;;  %v285_v60 = vld [vmem:[%s2236_s1 + $0x828] sm:$0xff]  ;;  %v302_v61 = vld [vmem:[%s2236_s1 + $0x8b0] sm:$0xff]  ;;  %v284_v0 = vld [vmem:[%s2236_s1 + $0x820] sm:$0xff] }
  0x80   :  { %721 = vmatpush.msrb.mxu0 %v219_v4  ;;  %740 = vmatpush.msrb.mxu1 %v236_v5  ;;  %v317_v62 = vld [vmem:[%s2236_s1 + $0x928] sm:$0xff]  ;;  %v334_v63 = vld [vmem:[%s2236_s1 + $0x9b0] sm:$0xff]  ;;  %v316_v2 = vld [vmem:[%s2236_s1 + $0x920] sm:$0xff] }
  0x81   :  { %761 = vmatpush.msrb.mxu2 %v251_v6  ;;  %780 = vmatpush.msrb.mxu3 %v268_v7  ;;  %v301_v1 = vld [vmem:[%s2236_s1 + $0x8a8] sm:$0xff]  ;;  %v283_v4 = vld [vmem:[%s2236_s1 + $0x818] sm:$0xff]  ;;  %v300_v5 = vld [vmem:[%s2236_s1 + $0x8a0] sm:$0xff] }
  0x82   :  { %722 = vmatpush.msrb.mxu0 %v218_v8  ;;  %741 = vmatpush.msrb.mxu1 %v235_v9  ;;  %v333_v3 = vld [vmem:[%s2236_s1 + $0x9a8] sm:$0xff]  ;;  %v315_v6 = vld [vmem:[%s2236_s1 + $0x918] sm:$0xff]  ;;  %v332_v7 = vld [vmem:[%s2236_s1 + $0x9a0] sm:$0xff] }
  0x83   :  { %762 = vmatpush.msrb.mxu2 %v250_v10  ;;  %781 = vmatpush.msrb.mxu3 %v267_v11  ;;  %v282_v8 = vld [vmem:[%s2236_s1 + $0x810] sm:$0xff]  ;;  %v299_v9 = vld [vmem:[%s2236_s1 + $0x898] sm:$0xff] }
  0x84   :  { %723 = vmatpush.msrb.mxu0 %v217_v12  ;;  %742 = vmatpush.msrb.mxu1 %v234_v13  ;;  %v314_v10 = vld [vmem:[%s2236_s1 + $0x910] sm:$0xff]  ;;  %v331_v11 = vld [vmem:[%s2236_s1 + $0x998] sm:$0xff]  ;;  %v281_v12 = vld [vmem:[%s2236_s1 + $0x808] sm:$0xff] }
  0x85   :  { %763 = vmatpush.msrb.mxu2 %v249_v14  ;;  %782 = vmatpush.msrb.mxu3 %v266_v15  ;;  %v298_v13 = vld [vmem:[%s2236_s1 + $0x890] sm:$0xff]  ;;  %v313_v14 = vld [vmem:[%s2236_s1 + $0x908] sm:$0xff] }
  0x86   :  { %724 = vmatpush.msrb.mxu0 %v216_v16  ;;  %743 = vmatpush.msrb.mxu1 %v233_v17  ;;  %v330_v15 = vld [vmem:[%s2236_s1 + $0x990] sm:$0xff]  ;;  %v280_v16 = vld [vmem:[%s2236_s1 + $0x800] sm:$0xff]  ;;  %v297_v17 = vld [vmem:[%s2236_s1 + $0x888] sm:$0xff] }
  0x87   :  { %764 = vmatpush.msrb.mxu2 %v248_v18  ;;  %783 = vmatpush.msrb.mxu3 %v265_v19  ;;  %v312_v18 = vld [vmem:[%s2236_s1 + $0x900] sm:$0xff]  ;;  %v329_v19 = vld [vmem:[%s2236_s1 + $0x988] sm:$0xff] }
  0x88   :  { %725 = vmatmul.f32.vlgmr.msrb.gmra.mxu0 %v1674_v29  ;;  %765 = vmatmul.f32.vlgmr.msrb.gmra.mxu2 %v1676_v31  ;;  %v293_v29 = vld [vmem:[%s2236_s1 + $0x868] sm:$0xff]  ;;  %v310_v31 = vld [vmem:[%s2236_s1 + $0x8f0] sm:$0xff] }
  0x89   :  { %789 = vmatpush.msra.mxu0 %v295_v20  ;;  %829 = vmatpush.msra.mxu2 %v327_v21  ;;  %v437_v20 = vld.sshfl [vmem:[#allocation1] sm:$0xff pattern:$0x73625140]  ;;  %v439_v21 = vld.sshfl [vmem:[#allocation1 + $0x10] sm:$0xff pattern:$0x73625140] }
  0x8a   :  { %744 = vmatpush.msrb.mxu1 %v232_v22  ;;  %784 = vmatpush.msrb.mxu3 %v264_v23  ;;  %v359_v22 = vld [vmem:[%s2236_s1 + $0xa78] sm:$0xff] }
  0x8b   :  { %745 = vmatmul.f32.vlgmr.msrb.gmra.mxu1 %v1678_v32  ;;  %785 = vmatmul.f32.vlgmr.msrb.gmra.mxu3 %v1686_v33  ;;  %v342_v32 = vld [vmem:[%s2236_s1 + $0x9f0] sm:$0xff]  ;;  %v309_v33 = vld [vmem:[%s2236_s1 + $0x8e8] sm:$0xff]  ;;  %v391_v23 = vld [vmem:[%s2236_s1 + $0xb78] sm:$0xff] }
  0x8c   :  { %790 = vmatpush.msra.mxu0 %v294_v24  ;;  %809 = vmatpush.msra.mxu1 %v311_v25  ;;  %v296_v24 = vld [vmem:[%s2236_s1 + $0x880] sm:$0xff] }
  0x8d   :  { %830 = vmatpush.msra.mxu2 %v326_v26  ;;  %849 = vmatpush.msra.mxu3 %v343_v28  ;;  %v328_v25 = vld [vmem:[%s2236_s1 + $0x980] sm:$0xff]  ;;  %v438_v26 = vld.sshfl [vmem:[#allocation1 + $0x8] sm:$0xff pattern:$0x73625140] }
  0x8e   :  { %791 = vmatpush.msra.mxu0 %v293_v29  ;;  %810 = vmatpush.msra.mxu1 %v310_v31  ;;  %v440_v28 = vld.sshfl [vmem:[#allocation1 + $0x18] sm:$0xff pattern:$0x73625140]  ;;  %v358_v29 = vld [vmem:[%s2236_s1 + $0xa70] sm:$0xff] }
  0x8f   :  { %831 = vmatpush.msra.mxu2 %v325_v27  ;;  %850 = vmatpush.msra.mxu3 %v342_v32  ;;  %v375_v31 = vld [vmem:[%s2236_s1 + $0xaf8] sm:$0xff]  ;;  %v390_v27 = vld [vmem:[%s2236_s1 + $0xb70] sm:$0xff] }
  0x90   :  { %792 = vmatpush.msra.mxu0 %v292_v30  ;;  %811 = vmatpush.msra.mxu1 %v309_v33  ;;  %v407_v32 = vld [vmem:[%s2236_s1 + $0xbf8] sm:$0xff]  ;;  %v357_v30 = vld [vmem:[%s2236_s1 + $0xa68] sm:$0xff]  ;;  %v374_v33 = vld [vmem:[%s2236_s1 + $0xaf0] sm:$0xff] }
  0x91   :  { %832 = vmatpush.msra.mxu2 %v324_v34  ;;  %851 = vmatpush.msra.mxu3 %v341_v35  ;;  %v389_v34 = vld [vmem:[%s2236_s1 + $0xb68] sm:$0xff]  ;;  %v406_v35 = vld [vmem:[%s2236_s1 + $0xbf0] sm:$0xff] }
  0x92   :  { %793 = vmatpush.msra.mxu0 %v291_v36  ;;  %812 = vmatpush.msra.mxu1 %v308_v37  ;;  %v356_v36 = vld [vmem:[%s2236_s1 + $0xa60] sm:$0xff]  ;;  %v373_v37 = vld [vmem:[%s2236_s1 + $0xae8] sm:$0xff] }
  0x93   :  { %833 = vmatpush.msra.mxu2 %v323_v38  ;;  %852 = vmatpush.msra.mxu3 %v340_v39  ;;  %v388_v38 = vld [vmem:[%s2236_s1 + $0xb60] sm:$0xff]  ;;  %v405_v39 = vld [vmem:[%s2236_s1 + $0xbe8] sm:$0xff] }
  0x94   :  { %794 = vmatpush.msra.mxu0 %v290_v40  ;;  %813 = vmatpush.msra.mxu1 %v307_v41  ;;  %v355_v40 = vld [vmem:[%s2236_s1 + $0xa58] sm:$0xff]  ;;  %v372_v41 = vld [vmem:[%s2236_s1 + $0xae0] sm:$0xff] }
  0x95   :  { %834 = vmatpush.msra.mxu2 %v322_v42  ;;  %853 = vmatpush.msra.mxu3 %v339_v43  ;;  %v387_v42 = vld [vmem:[%s2236_s1 + $0xb58] sm:$0xff]  ;;  %v404_v43 = vld [vmem:[%s2236_s1 + $0xbe0] sm:$0xff] }
  0x96   :  { %795 = vmatpush.msra.mxu0 %v289_v44  ;;  %814 = vmatpush.msra.mxu1 %v306_v45  ;;  %v354_v44 = vld [vmem:[%s2236_s1 + $0xa50] sm:$0xff]  ;;  %v371_v45 = vld [vmem:[%s2236_s1 + $0xad8] sm:$0xff] }
  0x97   :  { %835 = vmatpush.msra.mxu2 %v321_v46  ;;  %854 = vmatpush.msra.mxu3 %v338_v47  ;;  %v386_v46 = vld [vmem:[%s2236_s1 + $0xb50] sm:$0xff]  ;;  %v403_v47 = vld [vmem:[%s2236_s1 + $0xbd8] sm:$0xff] }
  0x98   :  { %796 = vmatpush.msra.mxu0 %v288_v48  ;;  %815 = vmatpush.msra.mxu1 %v305_v49  ;;  %v353_v48 = vld [vmem:[%s2236_s1 + $0xa48] sm:$0xff]  ;;  %v370_v49 = vld [vmem:[%s2236_s1 + $0xad0] sm:$0xff] }
  0x99   :  { %836 = vmatpush.msra.mxu2 %v320_v50  ;;  %855 = vmatpush.msra.mxu3 %v337_v51  ;;  %v385_v50 = vld [vmem:[%s2236_s1 + $0xb48] sm:$0xff]  ;;  %v402_v51 = vld [vmem:[%s2236_s1 + $0xbd0] sm:$0xff] }
  0x9a   :  { %797 = vmatpush.msra.mxu0 %v287_v52  ;;  %816 = vmatpush.msra.mxu1 %v304_v53  ;;  %v352_v52 = vld [vmem:[%s2236_s1 + $0xa40] sm:$0xff]  ;;  %v369_v53 = vld [vmem:[%s2236_s1 + $0xac8] sm:$0xff] }
  0x9b   :  { %837 = vmatpush.msra.mxu2 %v319_v54  ;;  %856 = vmatpush.msra.mxu3 %v336_v55  ;;  %v384_v54 = vld [vmem:[%s2236_s1 + $0xb40] sm:$0xff]  ;;  %v401_v55 = vld [vmem:[%s2236_s1 + $0xbc8] sm:$0xff] }
  0x9c   :  { %798 = vmatpush.msra.mxu0 %v286_v56  ;;  %817 = vmatpush.msra.mxu1 %v303_v57  ;;  %v351_v56 = vld [vmem:[%s2236_s1 + $0xa38] sm:$0xff]  ;;  %v368_v57 = vld [vmem:[%s2236_s1 + $0xac0] sm:$0xff] }
  0x9d   :  { %838 = vmatpush.msra.mxu2 %v318_v58  ;;  %857 = vmatpush.msra.mxu3 %v335_v59  ;;  %v383_v58 = vld [vmem:[%s2236_s1 + $0xb38] sm:$0xff]  ;;  %v400_v59 = vld [vmem:[%s2236_s1 + $0xbc0] sm:$0xff] }
  0x9e   :  { %799 = vmatpush.msra.mxu0 %v285_v60  ;;  %818 = vmatpush.msra.mxu1 %v302_v61  ;;  %v350_v60 = vld [vmem:[%s2236_s1 + $0xa30] sm:$0xff]  ;;  %v367_v61 = vld [vmem:[%s2236_s1 + $0xab8] sm:$0xff] }
  0x9f   :  { %839 = vmatpush.msra.mxu2 %v317_v62  ;;  %858 = vmatpush.msra.mxu3 %v334_v63  ;;  %v382_v62 = vld [vmem:[%s2236_s1 + $0xb30] sm:$0xff]  ;;  %v399_v63 = vld [vmem:[%s2236_s1 + $0xbb8] sm:$0xff] }
  0xa0   :  { %800 = vmatpush.msra.mxu0 %v284_v0  ;;  %819 = vmatpush.msra.mxu1 %v301_v1  ;;  %v349_v0 = vld [vmem:[%s2236_s1 + $0xa28] sm:$0xff]  ;;  %v366_v1 = vld [vmem:[%s2236_s1 + $0xab0] sm:$0xff] }
  0xa1   :  { %840 = vmatpush.msra.mxu2 %v316_v2  ;;  %859 = vmatpush.msra.mxu3 %v333_v3  ;;  %v381_v2 = vld [vmem:[%s2236_s1 + $0xb28] sm:$0xff]  ;;  %v398_v3 = vld [vmem:[%s2236_s1 + $0xbb0] sm:$0xff] }
  0xa2   :  { %801 = vmatpush.msra.mxu0 %v283_v4  ;;  %820 = vmatpush.msra.mxu1 %v300_v5  ;;  %v348_v4 = vld [vmem:[%s2236_s1 + $0xa20] sm:$0xff]  ;;  %v365_v5 = vld [vmem:[%s2236_s1 + $0xaa8] sm:$0xff] }
  0xa3   :  { %841 = vmatpush.msra.mxu2 %v315_v6  ;;  %860 = vmatpush.msra.mxu3 %v332_v7  ;;  %v380_v6 = vld [vmem:[%s2236_s1 + $0xb20] sm:$0xff]  ;;  %v397_v7 = vld [vmem:[%s2236_s1 + $0xba8] sm:$0xff] }
  0xa4   :  { %802 = vmatpush.msra.mxu0 %v282_v8  ;;  %821 = vmatpush.msra.mxu1 %v299_v9  ;;  %v347_v8 = vld [vmem:[%s2236_s1 + $0xa18] sm:$0xff]  ;;  %v364_v9 = vld [vmem:[%s2236_s1 + $0xaa0] sm:$0xff] }
  0xa5   :  { %842 = vmatpush.msra.mxu2 %v314_v10  ;;  %861 = vmatpush.msra.mxu3 %v331_v11  ;;  %v379_v10 = vld [vmem:[%s2236_s1 + $0xb18] sm:$0xff]  ;;  %v396_v11 = vld [vmem:[%s2236_s1 + $0xba0] sm:$0xff] }
  0xa6   :  { %803 = vmatpush.msra.mxu0 %v281_v12  ;;  %822 = vmatpush.msra.mxu1 %v298_v13  ;;  %v346_v12 = vld [vmem:[%s2236_s1 + $0xa10] sm:$0xff]  ;;  %v363_v13 = vld [vmem:[%s2236_s1 + $0xa98] sm:$0xff] }
  0xa7   :  { %843 = vmatpush.msra.mxu2 %v313_v14  ;;  %862 = vmatpush.msra.mxu3 %v330_v15  ;;  %v378_v14 = vld [vmem:[%s2236_s1 + $0xb10] sm:$0xff]  ;;  %v395_v15 = vld [vmem:[%s2236_s1 + $0xb98] sm:$0xff] }
  0xa8   :  { %804 = vmatpush.msra.mxu0 %v280_v16  ;;  %823 = vmatpush.msra.mxu1 %v297_v17  ;;  %v345_v16 = vld [vmem:[%s2236_s1 + $0xa08] sm:$0xff]  ;;  %v362_v17 = vld [vmem:[%s2236_s1 + $0xa90] sm:$0xff] }
  0xa9   :  { %844 = vmatpush.msra.mxu2 %v312_v18  ;;  %863 = vmatpush.msra.mxu3 %v329_v19  ;;  %v377_v18 = vld [vmem:[%s2236_s1 + $0xb08] sm:$0xff]  ;;  %v394_v19 = vld [vmem:[%s2236_s1 + $0xb90] sm:$0xff] }
  0xaa   :  { %805 = vmatmul.f32.vlgmr.msra.gmra.mxu0 %v437_v20  ;;  %845 = vmatmul.f32.vlgmr.msra.gmra.mxu2 %v439_v21  ;;  %v344_v20 = vld [vmem:[%s2236_s1 + $0xa00] sm:$0xff]  ;;  %v361_v21 = vld [vmem:[%s2236_s1 + $0xa88] sm:$0xff] }
  0xab   :  { %869 = vmatpush.msrb.mxu0 %v359_v22  ;;  %909 = vmatpush.msrb.mxu2 %v391_v23  ;;  %v376_v22 = vld [vmem:[%s2236_s1 + $0xb00] sm:$0xff]  ;;  %v393_v23 = vld [vmem:[%s2236_s1 + $0xb88] sm:$0xff] }
  0xac   :  { %824 = vmatpush.msra.mxu1 %v296_v24  ;;  %864 = vmatpush.msra.mxu3 %v328_v25  ;;  %v441_v24 = vld.sshfl [vmem:[#allocation1 + $0x20] sm:$0xff pattern:$0x73625140]  ;;  %v443_v25 = vld.sshfl [vmem:[#allocation1 + $0x30] sm:$0xff pattern:$0x73625140] }
  0xad   :  { %825 = vmatmul.f32.vlgmr.msra.gmra.mxu1 %v438_v26  ;;  %865 = vmatmul.f32.vlgmr.msra.gmra.mxu3 %v440_v28  ;;  %v360_v26 = vld [vmem:[%s2236_s1 + $0xa80] sm:$0xff] }
  0xae   :  { %870 = vmatpush.msrb.mxu0 %v358_v29  ;;  %889 = vmatpush.msrb.mxu1 %v375_v31  ;;  %v392_v28 = vld [vmem:[%s2236_s1 + $0xb80] sm:$0xff]  ;;  %v442_v29 = vld.sshfl [vmem:[#allocation1 + $0x28] sm:$0xff pattern:$0x73625140]  ;;  %s1001_s1 = smov [#allocation3]  }
  0xaf   :  { %910 = vmatpush.msrb.mxu2 %v390_v27  ;;  %929 = vmatpush.msrb.mxu3 %v407_v32  ;;  %v444_v31 = vld.sshfl [vmem:[#allocation1 + $0x38] sm:$0xff pattern:$0x73625140]  ;;  %s961_s20 = sshll.u32 %s1001_s1, 4  ;;  %s962_s20 = int_to_ptr.vmem [resolvable:$true] %s961_s20 }
  0xb0   :  { %871 = vmatpush.msrb.mxu0 %v357_v30  ;;  %890 = vmatpush.msrb.mxu1 %v374_v33 }
  0xb1   :  { %911 = vmatpush.msrb.mxu2 %v389_v34  ;;  %930 = vmatpush.msrb.mxu3 %v406_v35 }
  0xb2   :  { %872 = vmatpush.msrb.mxu0 %v356_v36  ;;  %891 = vmatpush.msrb.mxu1 %v373_v37 }
  0xb3   :  { %912 = vmatpush.msrb.mxu2 %v388_v38  ;;  %931 = vmatpush.msrb.mxu3 %v405_v39 }
  0xb4   :  { %873 = vmatpush.msrb.mxu0 %v355_v40  ;;  %892 = vmatpush.msrb.mxu1 %v372_v41 }
  0xb5   :  { %913 = vmatpush.msrb.mxu2 %v387_v42  ;;  %932 = vmatpush.msrb.mxu3 %v404_v43 }
  0xb6   :  { %874 = vmatpush.msrb.mxu0 %v354_v44  ;;  %893 = vmatpush.msrb.mxu1 %v371_v45 }
  0xb7   :  { %914 = vmatpush.msrb.mxu2 %v386_v46  ;;  %933 = vmatpush.msrb.mxu3 %v403_v47 }
  0xb8   :  { %875 = vmatpush.msrb.mxu0 %v353_v48  ;;  %894 = vmatpush.msrb.mxu1 %v370_v49 }
  0xb9   :  { %915 = vmatpush.msrb.mxu2 %v385_v50  ;;  %934 = vmatpush.msrb.mxu3 %v402_v51  ;;  %v1000_v51 = vmov 0.0  }
  0xba   :  { %876 = vmatpush.msrb.mxu0 %v352_v52  ;;  %895 = vmatpush.msrb.mxu1 %v369_v53  ;;  %16 = vst [vmem:[#allocation2] sm:$0x3] %v1000_v51 }
  0xbb   :  { %916 = vmatpush.msrb.mxu2 %v384_v54  ;;  %935 = vmatpush.msrb.mxu3 %v401_v55 }
  0xbc   :  { %877 = vmatpush.msrb.mxu0 %v351_v56  ;;  %896 = vmatpush.msrb.mxu1 %v368_v57 }
  0xbd   :  { %917 = vmatpush.msrb.mxu2 %v383_v58  ;;  %936 = vmatpush.msrb.mxu3 %v400_v59 }
  0xbe   :  { %878 = vmatpush.msrb.mxu0 %v350_v60  ;;  %897 = vmatpush.msrb.mxu1 %v367_v61 }
  0xbf   :  { %918 = vmatpush.msrb.mxu2 %v382_v62  ;;  %937 = vmatpush.msrb.mxu3 %v399_v63  ;;  %v486_v32 = vpop.f32.mrf.mxu0 }
  0xc0   :  { %879 = vmatpush.msrb.mxu0 %v349_v0  ;;  %898 = vmatpush.msrb.mxu1 %v366_v1 }
  0xc1   :  { %919 = vmatpush.msrb.mxu2 %v381_v2  ;;  %938 = vmatpush.msrb.mxu3 %v398_v3 }
  0xc2   :  { %880 = vmatpush.msrb.mxu0 %v348_v4  ;;  %899 = vmatpush.msrb.mxu1 %v365_v5  ;;  %v506_v27 = vpop.f32.mrf.mxu1 }
  0xc3   :  { %920 = vmatpush.msrb.mxu2 %v380_v6  ;;  %939 = vmatpush.msrb.mxu3 %v397_v7  ;;  %v507_v30 = vadd.f32 %v506_v27, %v486_v32  ;;  %v526_v33 = vpop.f32.mrf.mxu2 }
  0xc4   :  { %881 = vmatpush.msrb.mxu0 %v347_v8  ;;  %900 = vmatpush.msrb.mxu1 %v364_v9 }
  0xc5   :  { %921 = vmatpush.msrb.mxu2 %v379_v10  ;;  %940 = vmatpush.msrb.mxu3 %v396_v11  ;;  %v527_v34 = vadd.f32 %v526_v33, %v507_v30 }
  0xc6   :  { %882 = vmatpush.msrb.mxu0 %v346_v12  ;;  %901 = vmatpush.msrb.mxu1 %v363_v13  ;;  %v546_v35 = vpop.f32.mrf.mxu3  ;;  %v17_v12 = vld [vmem:[#allocation2] sm:$0x3] }
  0xc7   :  { %922 = vmatpush.msrb.mxu2 %v378_v14  ;;  %941 = vmatpush.msrb.mxu3 %v395_v15  ;;  %v547_v36 = vadd.f32 %v546_v35, %v527_v34 }
  0xc8   :  { %883 = vmatpush.msrb.mxu0 %v345_v16  ;;  %902 = vmatpush.msrb.mxu1 %v362_v17 }
  0xc9   :  { %923 = vmatpush.msrb.mxu2 %v377_v18  ;;  %942 = vmatpush.msrb.mxu3 %v394_v19  ;;  %v566_v37 = vpop.f32.mrf.mxu0 }
  0xca   :  { %884 = vmatpush.msrb.mxu0 %v344_v20  ;;  %903 = vmatpush.msrb.mxu1 %v361_v21  ;;  %v567_v38 = vadd.f32 %v566_v37, %v547_v36 }
  0xcb   :  { %924 = vmatpush.msrb.mxu2 %v376_v22  ;;  %943 = vmatpush.msrb.mxu3 %v393_v23 }
  0xcc   :  { %885 = vmatmul.f32.vlgmr.msrb.gmra.mxu0 %v441_v24  ;;  %925 = vmatmul.f32.vlgmr.msrb.gmra.mxu2 %v443_v25  ;;  %v586_v39 = vpop.f32.mrf.mxu1 }
  0xcd   :  { %904 = vmatpush.msrb.mxu1 %v360_v26  ;;  %944 = vmatpush.msrb.mxu3 %v392_v28  ;;  %v587_v40 = vadd.f32 %v586_v39, %v567_v38  ;;  %v606_v41 = vpop.f32.mrf.mxu2 }
  0xce   :  { %905 = vmatmul.f32.vlgmr.msrb.gmra.mxu1 %v442_v29  ;;  %945 = vmatmul.f32.vlgmr.msrb.gmra.mxu3 %v444_v31 }
  0xcf   :  { %v607_v42 = vadd.f32 %v606_v41, %v587_v40 }
  0xd0   :  { %v626_v43 = vpop.f32.mrf.mxu3 }
  0xd1   :  { %v627_v45 = vadd.f32 %v626_v43, %v607_v42 }
  0xe3   :  { %v646_v44 = vpop.f32.mrf.mxu0 }
  0xe4   :  { %v647_v46 = vadd.f32 %v646_v44, %v627_v45 }
  0xe6   :  { %v666_v47 = vpop.f32.mrf.mxu1 }
  0xe7   :  { %v667_v49 = vadd.f32 %v666_v47, %v647_v46 }
  0xe9   :  { %v686_v48 = vpop.f32.mrf.mxu2 }
  0xea   :  { %v687_v50 = vadd.f32 %v686_v48, %v667_v49 }
  0xec   :  { %v706_v52 = vpop.f32.mrf.mxu3 }
  0xed   :  { %v707_v54 = vadd.f32 %v706_v52, %v687_v50 }
 0x105   :  { %v726_v53 = vpop.f32.mrf.mxu0 }
 0x106   :  { %v727_v55 = vadd.f32 %v726_v53, %v707_v54 }
 0x108   :  { %v746_v56 = vpop.f32.mrf.mxu1 }
 0x109   :  { %v747_v58 = vadd.f32 %v746_v56, %v727_v55 }
 0x10b   :  { %v766_v57 = vpop.f32.mrf.mxu2 }
 0x10c   :  { %v767_v59 = vadd.f32 %v766_v57, %v747_v58 }
 0x10e   :  { %v786_v60 = vpop.f32.mrf.mxu3 }
 0x10f   :  { %v787_v62 = vadd.f32 %v786_v60, %v767_v59 }
 0x127   :  { %v806_v61 = vpop.f32.mrf.mxu0 }
 0x128   :  { %v807_v63 = vadd.f32 %v806_v61, %v787_v62 }
 0x12a   :  { %v826_v0 = vpop.f32.mrf.mxu1 }
 0x12b   :  { %v827_v2 = vadd.f32 %v826_v0, %v807_v63 }
 0x12d   :  { %v846_v1 = vpop.f32.mrf.mxu2 }
 0x12e   :  { %v847_v3 = vadd.f32 %v846_v1, %v827_v2 }
 0x130   :  { %v866_v4 = vpop.f32.mrf.mxu3 }
 0x131   :  { %v867_v5 = vadd.f32 %v866_v4, %v847_v3 }
 0x149   :  { %v886_v6 = vpop.f32.mrf.mxu0 }
 0x14a   :  { %v887_v7 = vadd.f32 %v886_v6, %v867_v5 }
 0x14b   :  { %v906_v8 = vpop.f32.mrf.mxu1 }
 0x14c   :  { %v907_v9 = vadd.f32 %v906_v8, %v887_v7 }
 0x14f   :  { %v926_v10 = vpop.f32.mrf.mxu2 }
 0x150   :  { %v927_v11 = vadd.f32 %v926_v10, %v907_v9 }
 0x151   :  { %v946_v13 = vpop.f32.mrf.mxu3 }
 0x152   :  { %v947_v14 = vadd.f32 %v946_v13, %v927_v11 }
 0x154   :  { %v949_v15 = vadd.f32 %v947_v14, %v17_v12 }
 0x156   :  { %950 = vst [vmem:[#allocation2] sm:$0x3] %v949_v15 }
 0x15d   :  { %v954_v16 = vld [vmem:[#allocation2] sm:$0x3] }
 0x15e   :  { %955 = vst [vmem:[#allocation3] sm:$0x3] %v954_v16 }
 0x15f   :  { %966 = dma.vmem_to_hbm [thread:$0]  %s962_s20, 32, %s964_s23, [#allocation4]  }
 0x160   :  { %998 = dma.done.wait [#allocation4], 32  }
 0x161   :  { %999 = vsyncadd [#allocation4], 4294967264 }
 0x162   :  { %971 = vsyncpa [#allocation4], 1 }

// kernel: combo_conv2d_meandim.1
= control target key start
LH: loop header
LB: loop body
LE: loop exit
PB: predicated region body
PF: predicated region fallthrough
CT: control target
= control target key end

     0   :  { %s2235_s0 = inlined_call_operand.vmem [shape: f32[2,3072], index: 0, kind: input, shape index: {}]   ;;  %s2236_s1 = inlined_call_operand.vmem [shape: f32[3072,128], index: 1, kind: input, shape index: {}]   ;;  %s2237_s2 = inlined_call_operand.hbm [shape: f32[2,128], index: 2, kind: output, shape index: {}]  }
   0x1   :  { %v39_v0 = vld [vmem:[%s2236_s1 + $0x78] sm:$0xff]  ;;  %v38_v2 = vld [vmem:[%s2236_s1 + $0x70] sm:$0xff]  ;;  %v37_v6 = vld [vmem:[%s2236_s1 + $0x68] sm:$0xff] }
   0x2   :  { %v71_v1 = vld [vmem:[%s2236_s1 + $0x178] sm:$0xff]  ;;  %469 = vmatpush.msra.mxu0 %v39_v0  ;;  %v70_v4 = vld [vmem:[%s2236_s1 + $0x170] sm:$0xff]  ;;  %v69_v8 = vld [vmem:[%s2236_s1 + $0x168] sm:$0xff] }
   0x3   :  { %509 = vmatpush.msra.mxu2 %v71_v1  ;;  %v55_v3 = vld [vmem:[%s2236_s1 + $0xf8] sm:$0xff]  ;;  %v54_v7 = vld [vmem:[%s2236_s1 + $0xf0] sm:$0xff]  ;;  %v53_v10 = vld [vmem:[%s2236_s1 + $0xe8] sm:$0xff] }
   0x4   :  { %v87_v5 = vld [vmem:[%s2236_s1 + $0x1f8] sm:$0xff]  ;;  %489 = vmatpush.msra.mxu1 %v55_v3  ;;  %470 = vmatpush.msra.mxu0 %v38_v2  ;;  %v86_v9 = vld [vmem:[%s2236_s1 + $0x1f0] sm:$0xff]  ;;  %v36_v11 = vld [vmem:[%s2236_s1 + $0x60] sm:$0xff] }
   0x5   :  { %529 = vmatpush.msra.mxu3 %v87_v5  ;;  %510 = vmatpush.msra.mxu2 %v70_v4  ;;  %v68_v12 = vld [vmem:[%s2236_s1 + $0x160] sm:$0xff]  ;;  %v85_v13 = vld [vmem:[%s2236_s1 + $0x1e8] sm:$0xff]  ;;  %v35_v16 = vld [vmem:[%s2236_s1 + $0x58] sm:$0xff] }
   0x6   :  { %490 = vmatpush.msra.mxu1 %v54_v7  ;;  %471 = vmatpush.msra.mxu0 %v37_v6  ;;  %v52_v14 = vld [vmem:[%s2236_s1 + $0xe0] sm:$0xff]  ;;  %v67_v17 = vld [vmem:[%s2236_s1 + $0x158] sm:$0xff]  ;;  %v34_v20 = vld [vmem:[%s2236_s1 + $0x50] sm:$0xff] }
   0x7   :  { %530 = vmatpush.msra.mxu3 %v86_v9  ;;  %511 = vmatpush.msra.mxu2 %v69_v8  ;;  %v84_v15 = vld [vmem:[%s2236_s1 + $0x1e0] sm:$0xff]  ;;  %v51_v18 = vld [vmem:[%s2236_s1 + $0xd8] sm:$0xff]  ;;  %v66_v21 = vld [vmem:[%s2236_s1 + $0x150] sm:$0xff] }
   0x8   :  { %491 = vmatpush.msra.mxu1 %v53_v10  ;;  %472 = vmatpush.msra.mxu0 %v36_v11  ;;  %v83_v19 = vld [vmem:[%s2236_s1 + $0x1d8] sm:$0xff]  ;;  %v50_v22 = vld [vmem:[%s2236_s1 + $0xd0] sm:$0xff]  ;;  %v33_v24 = vld [vmem:[%s2236_s1 + $0x48] sm:$0xff] }
   0x9   :  { %531 = vmatpush.msra.mxu3 %v85_v13  ;;  %512 = vmatpush.msra.mxu2 %v68_v12  ;;  %v82_v23 = vld [vmem:[%s2236_s1 + $0x1d0] sm:$0xff]  ;;  %v65_v25 = vld [vmem:[%s2236_s1 + $0x148] sm:$0xff]  ;;  %v32_v28 = vld [vmem:[%s2236_s1 + $0x40] sm:$0xff] }
   0xa   :  { %492 = vmatpush.msra.mxu1 %v52_v14  ;;  %473 = vmatpush.msra.mxu0 %v35_v16  ;;  %v49_v26 = vld [vmem:[%s2236_s1 + $0xc8] sm:$0xff]  ;;  %v64_v29 = vld [vmem:[%s2236_s1 + $0x140] sm:$0xff]  ;;  %v31_v32 = vld [vmem:[%s2236_s1 + $0x38] sm:$0xff] }
   0xb   :  { %532 = vmatpush.msra.mxu3 %v84_v15  ;;  %513 = vmatpush.msra.mxu2 %v67_v17  ;;  %v81_v27 = vld [vmem:[%s2236_s1 + $0x1c8] sm:$0xff]  ;;  %v48_v30 = vld [vmem:[%s2236_s1 + $0xc0] sm:$0xff]  ;;  %v63_v33 = vld [vmem:[%s2236_s1 + $0x138] sm:$0xff] }
   0xc   :  { %493 = vmatpush.msra.mxu1 %v51_v18  ;;  %474 = vmatpush.msra.mxu0 %v34_v20  ;;  %v80_v31 = vld [vmem:[%s2236_s1 + $0x1c0] sm:$0xff]  ;;  %v47_v34 = vld [vmem:[%s2236_s1 + $0xb8] sm:$0xff]  ;;  %v30_v36 = vld [vmem:[%s2236_s1 + $0x30] sm:$0xff] }
   0xd   :  { %533 = vmatpush.msra.mxu3 %v83_v19  ;;  %514 = vmatpush.msra.mxu2 %v66_v21  ;;  %v79_v35 = vld [vmem:[%s2236_s1 + $0x1b8] sm:$0xff]  ;;  %v62_v37 = vld [vmem:[%s2236_s1 + $0x130] sm:$0xff]  ;;  %v29_v40 = vld [vmem:[%s2236_s1 + $0x28] sm:$0xff] }
   0xe   :  { %494 = vmatpush.msra.mxu1 %v50_v22  ;;  %475 = vmatpush.msra.mxu0 %v33_v24  ;;  %v46_v38 = vld [vmem:[%s2236_s1 + $0xb0] sm:$0xff]  ;;  %v61_v41 = vld [vmem:[%s2236_s1 + $0x128] sm:$0xff]  ;;  %v28_v44 = vld [vmem:[%s2236_s1 + $0x20] sm:$0xff] }
   0xf   :  { %534 = vmatpush.msra.mxu3 %v82_v23  ;;  %515 = vmatpush.msra.mxu2 %v65_v25  ;;  %v78_v39 = vld [vmem:[%s2236_s1 + $0x1b0] sm:$0xff]  ;;  %v45_v42 = vld [vmem:[%s2236_s1 + $0xa8] sm:$0xff]  ;;  %v60_v45 = vld [vmem:[%s2236_s1 + $0x120] sm:$0xff] }
  0x10   :  { %495 = vmatpush.msra.mxu1 %v49_v26  ;;  %476 = vmatpush.msra.mxu0 %v32_v28  ;;  %v77_v43 = vld [vmem:[%s2236_s1 + $0x1a8] sm:$0xff]  ;;  %v44_v46 = vld [vmem:[%s2236_s1 + $0xa0] sm:$0xff]  ;;  %v27_v48 = vld [vmem:[%s2236_s1 + $0x18] sm:$0xff] }
  0x11   :  { %535 = vmatpush.msra.mxu3 %v81_v27  ;;  %516 = vmatpush.msra.mxu2 %v64_v29  ;;  %v76_v47 = vld [vmem:[%s2236_s1 + $0x1a0] sm:$0xff]  ;;  %v59_v49 = vld [vmem:[%s2236_s1 + $0x118] sm:$0xff]  ;;  %v26_v52 = vld [vmem:[%s2236_s1 + $0x10] sm:$0xff] }
  0x12   :  { %496 = vmatpush.msra.mxu1 %v48_v30  ;;  %477 = vmatpush.msra.mxu0 %v31_v32  ;;  %v43_v50 = vld [vmem:[%s2236_s1 + $0x98] sm:$0xff]  ;;  %v58_v53 = vld [vmem:[%s2236_s1 + $0x110] sm:$0xff]  ;;  %v25_v56 = vld [vmem:[%s2236_s1 + $0x8] sm:$0xff] }
  0x13   :  { %536 = vmatpush.msra.mxu3 %v80_v31  ;;  %517 = vmatpush.msra.mxu2 %v63_v33  ;;  %v75_v51 = vld [vmem:[%s2236_s1 + $0x198] sm:$0xff]  ;;  %v42_v54 = vld [vmem:[%s2236_s1 + $0x90] sm:$0xff]  ;;  %v57_v57 = vld [vmem:[%s2236_s1 + $0x108] sm:$0xff] }
  0x14   :  { %497 = vmatpush.msra.mxu1 %v47_v34  ;;  %478 = vmatpush.msra.mxu0 %v30_v36  ;;  %v74_v55 = vld [vmem:[%s2236_s1 + $0x190] sm:$0xff]  ;;  %v41_v58 = vld [vmem:[%s2236_s1 + $0x88] sm:$0xff]  ;;  %v24_v60 = vld [vmem:[%s2236_s1] sm:$0xff] }
  0x15   :  { %537 = vmatpush.msra.mxu3 %v79_v35  ;;  %518 = vmatpush.msra.mxu2 %v62_v37  ;;  %v73_v59 = vld [vmem:[%s2236_s1 + $0x188] sm:$0xff]  ;;  %v56_v61 = vld [vmem:[%s2236_s1 + $0x100] sm:$0xff]  ;;  %v103_v62 = vld [vmem:[%s2236_s1 + $0x278] sm:$0xff] }
  0x16   :  { %498 = vmatpush.msra.mxu1 %v46_v38  ;;  %479 = vmatpush.msra.mxu0 %v29_v40  ;;  %v135_v63 = vld [vmem:[%s2236_s1 + $0x378] sm:$0xff]  ;;  %v40_v0 = vld [vmem:[%s2236_s1 + $0x80] sm:$0xff]  ;;  %v102_v2 = vld [vmem:[%s2236_s1 + $0x270] sm:$0xff] }
  0x17   :  { %538 = vmatpush.msra.mxu3 %v78_v39  ;;  %519 = vmatpush.msra.mxu2 %v61_v41  ;;  %v72_v1 = vld [vmem:[%s2236_s1 + $0x180] sm:$0xff]  ;;  %v119_v3 = vld [vmem:[%s2236_s1 + $0x2f8] sm:$0xff]  ;;  %v134_v4 = vld [vmem:[%s2236_s1 + $0x370] sm:$0xff] }
  0x18   :  { %499 = vmatpush.msra.mxu1 %v45_v42  ;;  %480 = vmatpush.msra.mxu0 %v28_v44  ;;  %v151_v5 = vld [vmem:[%s2236_s1 + $0x3f8] sm:$0xff]  ;;  %v101_v6 = vld [vmem:[%s2236_s1 + $0x268] sm:$0xff]  ;;  %v118_v7 = vld [vmem:[%s2236_s1 + $0x2f0] sm:$0xff] }
  0x19   :  { %539 = vmatpush.msra.mxu3 %v77_v43  ;;  %520 = vmatpush.msra.mxu2 %v60_v45  ;;  %v133_v8 = vld [vmem:[%s2236_s1 + $0x368] sm:$0xff]  ;;  %v150_v9 = vld [vmem:[%s2236_s1 + $0x3f0] sm:$0xff]  ;;  %v100_v10 = vld [vmem:[%s2236_s1 + $0x260] sm:$0xff] }
  0x1a   :  { %500 = vmatpush.msra.mxu1 %v44_v46  ;;  %481 = vmatpush.msra.mxu0 %v27_v48  ;;  %v117_v11 = vld [vmem:[%s2236_s1 + $0x2e8] sm:$0xff]  ;;  %v132_v12 = vld [vmem:[%s2236_s1 + $0x360] sm:$0xff]  ;;  %v99_v14 = vld [vmem:[%s2236_s1 + $0x258] sm:$0xff] }
  0x1b   :  { %540 = vmatpush.msra.mxu3 %v76_v47  ;;  %521 = vmatpush.msra.mxu2 %v59_v49  ;;  %v149_v13 = vld [vmem:[%s2236_s1 + $0x3e8] sm:$0xff]  ;;  %v116_v15 = vld [vmem:[%s2236_s1 + $0x2e0] sm:$0xff]  ;;  %v131_v16 = vld [vmem:[%s2236_s1 + $0x358] sm:$0xff] }
  0x1c   :  { %501 = vmatpush.msra.mxu1 %v43_v50  ;;  %482 = vmatpush.msra.mxu0 %v26_v52  ;;  %v148_v17 = vld [vmem:[%s2236_s1 + $0x3e0] sm:$0xff]  ;;  %v98_v18 = vld [vmem:[%s2236_s1 + $0x250] sm:$0xff]  ;;  %v115_v19 = vld [vmem:[%s2236_s1 + $0x2d8] sm:$0xff] }
  0x1d   :  { %541 = vmatpush.msra.mxu3 %v75_v51  ;;  %522 = vmatpush.msra.mxu2 %v58_v53  ;;  %v130_v20 = vld [vmem:[%s2236_s1 + $0x350] sm:$0xff]  ;;  %v147_v21 = vld [vmem:[%s2236_s1 + $0x3d8] sm:$0xff]  ;;  %v18_v22 = vld [vmem:[%s2235_s0] sm:$0xff] }
  0x1e   :  { %502 = vmatpush.msra.mxu1 %v42_v54  ;;  %483 = vmatpush.msra.mxu0 %v25_v56  ;;  %v97_v23 = vld [vmem:[%s2236_s1 + $0x248] sm:$0xff]  ;;  %v114_v24 = vld [vmem:[%s2236_s1 + $0x2d0] sm:$0xff]  ;;  %414 = vst [vmem:[#allocation1] ss:$4 sm:$0xff] %v18_v22  ;;  %v96_v27 = vld [vmem:[%s2236_s1 + $0x240] sm:$0xff] }
  0x1f   :  { %542 = vmatpush.msra.mxu3 %v74_v55  ;;  %523 = vmatpush.msra.mxu2 %v57_v57  ;;  %v129_v25 = vld [vmem:[%s2236_s1 + $0x348] sm:$0xff]  ;;  %v146_v26 = vld [vmem:[%s2236_s1 + $0x3d0] sm:$0xff]  ;;  %v128_v29 = vld [vmem:[%s2236_s1 + $0x340] sm:$0xff] }
  0x20   :  { %503 = vmatpush.msra.mxu1 %v41_v58  ;;  %484 = vmatpush.msra.mxu0 %v24_v60  ;;  %v113_v28 = vld [vmem:[%s2236_s1 + $0x2c8] sm:$0xff]  ;;  %v95_v31 = vld [vmem:[%s2236_s1 + $0x238] sm:$0xff]  ;;  %v112_v32 = vld [vmem:[%s2236_s1 + $0x2c0] sm:$0xff] }
  0x21   :  { %543 = vmatpush.msra.mxu3 %v73_v59  ;;  %524 = vmatpush.msra.mxu2 %v56_v61  ;;  %v145_v30 = vld [vmem:[%s2236_s1 + $0x3c8] sm:$0xff]  ;;  %v127_v33 = vld [vmem:[%s2236_s1 + $0x338] sm:$0xff]  ;;  %v144_v34 = vld [vmem:[%s2236_s1 + $0x3c0] sm:$0xff] }
  0x22   :  { %549 = vmatpush.msrb.mxu0 %v103_v62  ;;  %504 = vmatpush.msra.mxu1 %v40_v0  ;;  %v94_v35 = vld [vmem:[%s2236_s1 + $0x230] sm:$0xff]  ;;  %v111_v36 = vld [vmem:[%s2236_s1 + $0x2b8] sm:$0xff]  ;;  %v19_v39 = vld [vmem:[%s2235_s0 + $0x8] sm:$0xff] }
  0x23   :  { %589 = vmatpush.msrb.mxu2 %v135_v63  ;;  %544 = vmatpush.msra.mxu3 %v72_v1  ;;  %v126_v37 = vld [vmem:[%s2236_s1 + $0x330] sm:$0xff]  ;;  %v143_v38 = vld [vmem:[%s2236_s1 + $0x3b8] sm:$0xff]  ;;  %v93_v40 = vld [vmem:[%s2236_s1 + $0x228] sm:$0xff]  ;;  %416 = vst [vmem:[#allocation1 + $0x20] ss:$4 sm:$0xff] %v19_v39 }
  0x24   :  { %550 = vmatpush.msrb.mxu0 %v102_v2  ;;  %569 = vmatpush.msrb.mxu1 %v119_v3  ;;  %v110_v41 = vld [vmem:[%s2236_s1 + $0x2b0] sm:$0xff]  ;;  %v125_v43 = vld [vmem:[%s2236_s1 + $0x328] sm:$0xff]  ;;  %v92_v49 = vld [vmem:[%s2236_s1 + $0x220] sm:$0xff] }
  0x25   :  { %590 = vmatpush.msrb.mxu2 %v134_v4  ;;  %609 = vmatpush.msrb.mxu3 %v151_v5  ;;  %v20_v42 = vld [vmem:[%s2235_s0 + $0x10] sm:$0xff]  ;;  %v1341_v45 = vld.sshfl [vmem:[#allocation1] sm:$0xff pattern:$0x73625140]  ;;  %v109_v50 = vld [vmem:[%s2236_s1 + $0x2a8] sm:$0xff] }
  0x26   :  { %551 = vmatpush.msrb.mxu0 %v101_v6  ;;  %570 = vmatpush.msrb.mxu1 %v118_v7  ;;  %v419_v44 = vld.sshfl [vmem:[#allocation1 + $0x10] sm:$0xff pattern:$0x73625140]  ;;  %v1343_v46 = vld.sshfl [vmem:[#allocation1 + $0x18] sm:$0xff pattern:$0x73625140] }
  0x27   :  { %591 = vmatpush.msrb.mxu2 %v133_v8  ;;  %610 = vmatpush.msrb.mxu3 %v150_v9  ;;  %v1345_v47 = vld.sshfl [vmem:[#allocation1 + $0x8] sm:$0xff pattern:$0x73625140]  ;;  %v142_v48 = vld [vmem:[%s2236_s1 + $0x3b0] sm:$0xff]  ;;  %v124_v51 = vld [vmem:[%s2236_s1 + $0x320] sm:$0xff] }
  0x28   :  { %552 = vmatpush.msrb.mxu0 %v100_v10  ;;  %571 = vmatpush.msrb.mxu1 %v117_v11  ;;  %425 = vst [vmem:[#allocation1] ss:$4 sm:$0xff] %v20_v42  ;;  %v141_v52 = vld [vmem:[%s2236_s1 + $0x3a8] sm:$0xff]  ;;  %v91_v53 = vld [vmem:[%s2236_s1 + $0x218] sm:$0xff]  ;;  %v108_v54 = vld [vmem:[%s2236_s1 + $0x2a0] sm:$0xff] }
  0x29   :  { %592 = vmatpush.msrb.mxu2 %v132_v12  ;;  %611 = vmatpush.msrb.mxu3 %v149_v13  ;;  %v123_v55 = vld [vmem:[%s2236_s1 + $0x318] sm:$0xff]  ;;  %v140_v56 = vld [vmem:[%s2236_s1 + $0x3a0] sm:$0xff]  ;;  %v90_v57 = vld [vmem:[%s2236_s1 + $0x210] sm:$0xff] }
  0x2a   :  { %553 = vmatpush.msrb.mxu0 %v99_v14  ;;  %572 = vmatpush.msrb.mxu1 %v116_v15  ;;  %v107_v58 = vld [vmem:[%s2236_s1 + $0x298] sm:$0xff]  ;;  %v1383_v60 = vld.sshfl [vmem:[#allocation1 + $0x30] sm:$0xff pattern:$0x73625140]  ;;  %v89_v2 = vld [vmem:[%s2236_s1 + $0x208] sm:$0xff] }
  0x2b   :  { %593 = vmatpush.msrb.mxu2 %v131_v16  ;;  %612 = vmatpush.msrb.mxu3 %v148_v17  ;;  %v21_v59 = vld [vmem:[%s2235_s0 + $0x18] sm:$0xff]  ;;  %v1385_v61 = vld.sshfl [vmem:[#allocation1 + $0x20] sm:$0xff pattern:$0x73625140]  ;;  %v122_v0 = vld [vmem:[%s2236_s1 + $0x310] sm:$0xff] }
  0x2c   :  { %554 = vmatpush.msrb.mxu0 %v98_v18  ;;  %573 = vmatpush.msrb.mxu1 %v115_v19  ;;  %v1387_v62 = vld.sshfl [vmem:[#allocation1 + $0x38] sm:$0xff pattern:$0x73625140]  ;;  %v1389_v63 = vld.sshfl [vmem:[#allocation1 + $0x28] sm:$0xff pattern:$0x73625140] }
  0x2d   :  { %594 = vmatpush.msrb.mxu2 %v130_v20  ;;  %613 = vmatpush.msrb.mxu3 %v147_v21  ;;  %v139_v1 = vld [vmem:[%s2236_s1 + $0x398] sm:$0xff]  ;;  %426 = vst [vmem:[#allocation1 + $0x20] ss:$4 sm:$0xff] %v21_v59  ;;  %v106_v3 = vld [vmem:[%s2236_s1 + $0x290] sm:$0xff]  ;;  %v121_v4 = vld [vmem:[%s2236_s1 + $0x308] sm:$0xff] }
  0x2e   :  { %555 = vmatpush.msrb.mxu0 %v97_v23  ;;  %574 = vmatpush.msrb.mxu1 %v114_v24  ;;  %v138_v5 = vld [vmem:[%s2236_s1 + $0x390] sm:$0xff]  ;;  %v88_v6 = vld [vmem:[%s2236_s1 + $0x200] sm:$0xff]  ;;  %v105_v7 = vld [vmem:[%s2236_s1 + $0x288] sm:$0xff] }
  0x2f   :  { %595 = vmatpush.msrb.mxu2 %v129_v25  ;;  %614 = vmatpush.msrb.mxu3 %v146_v26  ;;  %v120_v8 = vld [vmem:[%s2236_s1 + $0x300] sm:$0xff]  ;;  %v137_v9 = vld [vmem:[%s2236_s1 + $0x388] sm:$0xff]  ;;  %v167_v10 = vld [vmem:[%s2236_s1 + $0x478] sm:$0xff] }
  0x30   :  { %556 = vmatpush.msrb.mxu0 %v96_v27  ;;  %575 = vmatpush.msrb.mxu1 %v113_v28  ;;  %v199_v11 = vld [vmem:[%s2236_s1 + $0x578] sm:$0xff]  ;;  %v104_v12 = vld [vmem:[%s2236_s1 + $0x280] sm:$0xff]  ;;  %v166_v14 = vld [vmem:[%s2236_s1 + $0x470] sm:$0xff] }
  0x31   :  { %596 = vmatpush.msrb.mxu2 %v128_v29  ;;  %615 = vmatpush.msrb.mxu3 %v145_v30  ;;  %v136_v13 = vld [vmem:[%s2236_s1 + $0x380] sm:$0xff]  ;;  %v183_v15 = vld [vmem:[%s2236_s1 + $0x4f8] sm:$0xff]  ;;  %v198_v16 = vld [vmem:[%s2236_s1 + $0x570] sm:$0xff] }
  0x32   :  { %557 = vmatpush.msrb.mxu0 %v95_v31  ;;  %576 = vmatpush.msrb.mxu1 %v112_v32  ;;  %v215_v17 = vld [vmem:[%s2236_s1 + $0x5f8] sm:$0xff]  ;;  %v165_v18 = vld [vmem:[%s2236_s1 + $0x468] sm:$0xff]  ;;  %v182_v19 = vld [vmem:[%s2236_s1 + $0x4f0] sm:$0xff] }
  0x33   :  { %597 = vmatpush.msrb.mxu2 %v127_v33  ;;  %616 = vmatpush.msrb.mxu3 %v144_v34  ;;  %v197_v20 = vld [vmem:[%s2236_s1 + $0x568] sm:$0xff]  ;;  %v214_v21 = vld [vmem:[%s2236_s1 + $0x5f0] sm:$0xff]  ;;  %v164_v22 = vld [vmem:[%s2236_s1 + $0x460] sm:$0xff] }
  0x34   :  { %558 = vmatpush.msrb.mxu0 %v94_v35  ;;  %577 = vmatpush.msrb.mxu1 %v111_v36  ;;  %v181_v23 = vld [vmem:[%s2236_s1 + $0x4e8] sm:$0xff]  ;;  %v196_v24 = vld [vmem:[%s2236_s1 + $0x560] sm:$0xff]  ;;  %v1471_v26 = vld.sshfl [vmem:[#allocation1 + $0x10] sm:$0xff pattern:$0x73625140] }
  0x35   :  { %598 = vmatpush.msrb.mxu2 %v126_v37  ;;  %617 = vmatpush.msrb.mxu3 %v143_v38  ;;  %v1469_v25 = vld.sshfl [vmem:[#allocation1] sm:$0xff pattern:$0x73625140]  ;;  %v1473_v27 = vld.sshfl [vmem:[#allocation1 + $0x8] sm:$0xff pattern:$0x73625140] }
  0x36   :  { %559 = vmatpush.msrb.mxu0 %v93_v40  ;;  %578 = vmatpush.msrb.mxu1 %v110_v41  ;;  %v213_v28 = vld [vmem:[%s2236_s1 + $0x5e8] sm:$0xff]  ;;  %v22_v29 = vld [vmem:[%s2235_s0 + $0x20] sm:$0xff]  ;;  %v1481_v30 = vld.sshfl [vmem:[#allocation1 + $0x18] sm:$0xff pattern:$0x73625140] }
  0x37   :  { %599 = vmatpush.msrb.mxu2 %v125_v43  ;;  %618 = vmatpush.msrb.mxu3 %v142_v48  ;;  %v163_v31 = vld [vmem:[%s2236_s1 + $0x458] sm:$0xff]  ;;  %435 = vst [vmem:[#allocation1] ss:$4 sm:$0xff] %v22_v29  ;;  %v180_v32 = vld [vmem:[%s2236_s1 + $0x4e0] sm:$0xff] }
  0x38   :  { %560 = vmatpush.msrb.mxu0 %v92_v49  ;;  %579 = vmatpush.msrb.mxu1 %v109_v50  ;;  %v195_v33 = vld [vmem:[%s2236_s1 + $0x558] sm:$0xff] }
  0x39   :  { %600 = vmatpush.msrb.mxu2 %v124_v51  ;;  %619 = vmatpush.msrb.mxu3 %v141_v52 }
  0x3a   :  { %561 = vmatpush.msrb.mxu0 %v91_v53  ;;  %580 = vmatpush.msrb.mxu1 %v108_v54 }
  0x3b   :  { %601 = vmatpush.msrb.mxu2 %v123_v55  ;;  %620 = vmatpush.msrb.mxu3 %v140_v56 }
  0x3c   :  { %562 = vmatpush.msrb.mxu0 %v90_v57  ;;  %581 = vmatpush.msrb.mxu1 %v107_v58 }
  0x3d   :  { %602 = vmatpush.msrb.mxu2 %v122_v0  ;;  %621 = vmatpush.msrb.mxu3 %v139_v1 }
  0x3e   :  { %563 = vmatpush.msrb.mxu0 %v89_v2  ;;  %582 = vmatpush.msrb.mxu1 %v106_v3 }
  0x3f   :  { %603 = vmatpush.msrb.mxu2 %v121_v4  ;;  %622 = vmatpush.msrb.mxu3 %v138_v5 }
  0x40   :  { %525 = vmatmul.f32.vlgmr.msra.gmra.mxu2 %v419_v44  ;;  %564 = vmatpush.msrb.mxu0 %v88_v6 }
  0x41   :  { %583 = vmatpush.msrb.mxu1 %v105_v7  ;;  %604 = vmatpush.msrb.mxu2 %v120_v8 }
  0x42   :  { %623 = vmatpush.msrb.mxu3 %v137_v9  ;;  %485 = vmatmul.f32.vlgmr.msra.gmra.mxu0 %v1341_v45 }
  0x43   :  { %545 = vmatmul.f32.vlgmr.msra.gmra.mxu3 %v1343_v46  ;;  %629 = vmatpush.msra.mxu0 %v167_v10 }
  0x44   :  { %669 = vmatpush.msra.mxu2 %v199_v11  ;;  %584 = vmatpush.msrb.mxu1 %v104_v12 }
  0x45   :  { %624 = vmatpush.msrb.mxu3 %v136_v13  ;;  %505 = vmatmul.f32.vlgmr.msra.gmra.mxu1 %v1345_v47 }
  0x46   :  { %630 = vmatpush.msra.mxu0 %v166_v14  ;;  %649 = vmatpush.msra.mxu1 %v183_v15 }
  0x47   :  { %670 = vmatpush.msra.mxu2 %v198_v16  ;;  %689 = vmatpush.msra.mxu3 %v215_v17 }
  0x48   :  { %631 = vmatpush.msra.mxu0 %v165_v18  ;;  %650 = vmatpush.msra.mxu1 %v182_v19 }
  0x49   :  { %671 = vmatpush.msra.mxu2 %v197_v20  ;;  %690 = vmatpush.msra.mxu3 %v214_v21 }
  0x4a   :  { %605 = vmatmul.f32.vlgmr.msrb.gmra.mxu2 %v1383_v60  ;;  %632 = vmatpush.msra.mxu0 %v164_v22 }
  0x4b   :  { %651 = vmatpush.msra.mxu1 %v181_v23  ;;  %672 = vmatpush.msra.mxu2 %v196_v24 }
  0x4c   :  { %7 = vsyncpa [#allocation4], 0  ;;  %691 = vmatpush.msra.mxu3 %v213_v28  ;;  %565 = vmatmul.f32.vlgmr.msrb.gmra.mxu0 %v1385_v61  ;;  %v212_v34 = vld [vmem:[%s2236_s1 + $0x5e0] sm:$0xff]  ;;  %v162_v35 = vld [vmem:[%s2236_s1 + $0x450] sm:$0xff]  ;;  %s963_s23 = sshll.u32 %s2237_s2, 4  ;;  %s964_s23 = int_to_ptr.hbm [resolvable:$true] %s963_s23 }
  0x4d   :  { %625 = vmatmul.f32.vlgmr.msrb.gmra.mxu3 %v1387_v62  ;;  %633 = vmatpush.msra.mxu0 %v163_v31  ;;  %v179_v36 = vld [vmem:[%s2236_s1 + $0x4d8] sm:$0xff]  ;;  %v194_v37 = vld [vmem:[%s2236_s1 + $0x550] sm:$0xff]  ;;  %v161_v39 = vld [vmem:[%s2236_s1 + $0x448] sm:$0xff] }
  0x4e   :  { %652 = vmatpush.msra.mxu1 %v180_v32  ;;  %673 = vmatpush.msra.mxu2 %v195_v33  ;;  %v211_v38 = vld [vmem:[%s2236_s1 + $0x5d8] sm:$0xff]  ;;  %v178_v40 = vld [vmem:[%s2236_s1 + $0x4d0] sm:$0xff]  ;;  %v193_v41 = vld [vmem:[%s2236_s1 + $0x548] sm:$0xff] }
  0x4f   :  { %692 = vmatpush.msra.mxu3 %v212_v34  ;;  %585 = vmatmul.f32.vlgmr.msrb.gmra.mxu1 %v1389_v63  ;;  %v210_v42 = vld [vmem:[%s2236_s1 + $0x5d0] sm:$0xff]  ;;  %v160_v43 = vld [vmem:[%s2236_s1 + $0x440] sm:$0xff]  ;;  %v177_v44 = vld [vmem:[%s2236_s1 + $0x4c8] sm:$0xff] }
  0x50   :  { %634 = vmatpush.msra.mxu0 %v162_v35  ;;  %653 = vmatpush.msra.mxu1 %v179_v36  ;;  %v192_v45 = vld [vmem:[%s2236_s1 + $0x540] sm:$0xff]  ;;  %v209_v46 = vld [vmem:[%s2236_s1 + $0x5c8] sm:$0xff]  ;;  %v159_v47 = vld [vmem:[%s2236_s1 + $0x438] sm:$0xff] }
  0x51   :  { %674 = vmatpush.msra.mxu2 %v194_v37  ;;  %693 = vmatpush.msra.mxu3 %v211_v38  ;;  %v176_v48 = vld [vmem:[%s2236_s1 + $0x4c0] sm:$0xff]  ;;  %v191_v49 = vld [vmem:[%s2236_s1 + $0x538] sm:$0xff]  ;;  %v158_v51 = vld [vmem:[%s2236_s1 + $0x430] sm:$0xff] }
  0x52   :  { %635 = vmatpush.msra.mxu0 %v161_v39  ;;  %654 = vmatpush.msra.mxu1 %v178_v40  ;;  %v208_v50 = vld [vmem:[%s2236_s1 + $0x5c0] sm:$0xff]  ;;  %v175_v52 = vld [vmem:[%s2236_s1 + $0x4b8] sm:$0xff]  ;;  %v190_v53 = vld [vmem:[%s2236_s1 + $0x530] sm:$0xff] }
  0x53   :  { %675 = vmatpush.msra.mxu2 %v193_v41  ;;  %694 = vmatpush.msra.mxu3 %v210_v42  ;;  %v207_v54 = vld [vmem:[%s2236_s1 + $0x5b8] sm:$0xff]  ;;  %v157_v55 = vld [vmem:[%s2236_s1 + $0x428] sm:$0xff]  ;;  %v174_v56 = vld [vmem:[%s2236_s1 + $0x4b0] sm:$0xff] }
  0x54   :  { %636 = vmatpush.msra.mxu0 %v160_v43  ;;  %655 = vmatpush.msra.mxu1 %v177_v44  ;;  %v189_v57 = vld [vmem:[%s2236_s1 + $0x528] sm:$0xff]  ;;  %v206_v58 = vld [vmem:[%s2236_s1 + $0x5b0] sm:$0xff]  ;;  %v156_v59 = vld [vmem:[%s2236_s1 + $0x420] sm:$0xff] }
  0x55   :  { %676 = vmatpush.msra.mxu2 %v192_v45  ;;  %695 = vmatpush.msra.mxu3 %v209_v46  ;;  %v173_v60 = vld [vmem:[%s2236_s1 + $0x4a8] sm:$0xff]  ;;  %v188_v61 = vld [vmem:[%s2236_s1 + $0x520] sm:$0xff]  ;;  %v155_v63 = vld [vmem:[%s2236_s1 + $0x418] sm:$0xff] }
  0x56   :  { %637 = vmatpush.msra.mxu0 %v159_v47  ;;  %656 = vmatpush.msra.mxu1 %v176_v48  ;;  %v205_v62 = vld [vmem:[%s2236_s1 + $0x5a8] sm:$0xff]  ;;  %v172_v0 = vld [vmem:[%s2236_s1 + $0x4a0] sm:$0xff]  ;;  %v187_v1 = vld [vmem:[%s2236_s1 + $0x518] sm:$0xff] }
  0x57   :  { %677 = vmatpush.msra.mxu2 %v191_v49  ;;  %696 = vmatpush.msra.mxu3 %v208_v50  ;;  %v204_v2 = vld [vmem:[%s2236_s1 + $0x5a0] sm:$0xff]  ;;  %v154_v3 = vld [vmem:[%s2236_s1 + $0x410] sm:$0xff]  ;;  %v171_v4 = vld [vmem:[%s2236_s1 + $0x498] sm:$0xff] }
  0x58   :  { %638 = vmatpush.msra.mxu0 %v158_v51  ;;  %657 = vmatpush.msra.mxu1 %v175_v52  ;;  %v186_v5 = vld [vmem:[%s2236_s1 + $0x510] sm:$0xff]  ;;  %v203_v6 = vld [vmem:[%s2236_s1 + $0x598] sm:$0xff]  ;;  %v153_v7 = vld [vmem:[%s2236_s1 + $0x408] sm:$0xff] }
  0x59   :  { %678 = vmatpush.msra.mxu2 %v190_v53  ;;  %697 = vmatpush.msra.mxu3 %v207_v54  ;;  %v170_v8 = vld [vmem:[%s2236_s1 + $0x490] sm:$0xff]  ;;  %v185_v9 = vld [vmem:[%s2236_s1 + $0x508] sm:$0xff]  ;;  %v152_v11 = vld [vmem:[%s2236_s1 + $0x400] sm:$0xff] }
  0x5a   :  { %639 = vmatpush.msra.mxu0 %v157_v55  ;;  %658 = vmatpush.msra.mxu1 %v174_v56  ;;  %v202_v10 = vld [vmem:[%s2236_s1 + $0x590] sm:$0xff]  ;;  %v169_v12 = vld [vmem:[%s2236_s1 + $0x488] sm:$0xff]  ;;  %v184_v13 = vld [vmem:[%s2236_s1 + $0x500] sm:$0xff] }
  0x5b   :  { %679 = vmatpush.msra.mxu2 %v189_v57  ;;  %698 = vmatpush.msra.mxu3 %v206_v58  ;;  %v201_v14 = vld [vmem:[%s2236_s1 + $0x588] sm:$0xff]  ;;  %v231_v15 = vld [vmem:[%s2236_s1 + $0x678] sm:$0xff]  ;;  %v168_v17 = vld [vmem:[%s2236_s1 + $0x480] sm:$0xff] }
  0x5c   :  { %640 = vmatpush.msra.mxu0 %v156_v59  ;;  %659 = vmatpush.msra.mxu1 %v173_v60  ;;  %v263_v16 = vld [vmem:[%s2236_s1 + $0x778] sm:$0xff]  ;;  %v200_v18 = vld [vmem:[%s2236_s1 + $0x580] sm:$0xff]  ;;  %v230_v19 = vld [vmem:[%s2236_s1 + $0x670] sm:$0xff] }
  0x5d   :  { %680 = vmatpush.msra.mxu2 %v188_v61  ;;  %699 = vmatpush.msra.mxu3 %v205_v62  ;;  %v247_v20 = vld [vmem:[%s2236_s1 + $0x6f8] sm:$0xff]  ;;  %v262_v21 = vld [vmem:[%s2236_s1 + $0x770] sm:$0xff]  ;;  %v229_v23 = vld [vmem:[%s2236_s1 + $0x668] sm:$0xff] }
  0x5e   :  { %641 = vmatpush.msra.mxu0 %v155_v63  ;;  %660 = vmatpush.msra.mxu1 %v172_v0  ;;  %v279_v22 = vld [vmem:[%s2236_s1 + $0x7f8] sm:$0xff]  ;;  %v246_v24 = vld [vmem:[%s2236_s1 + $0x6f0] sm:$0xff]  ;;  %v228_v28 = vld [vmem:[%s2236_s1 + $0x660] sm:$0xff] }
  0x5f   :  { %681 = vmatpush.msra.mxu2 %v187_v1  ;;  %700 = vmatpush.msra.mxu3 %v204_v2  ;;  %v1674_v29 = vld.sshfl [vmem:[#allocation1 + $0x20] sm:$0xff pattern:$0x73625140]  ;;  %v1676_v31 = vld.sshfl [vmem:[#allocation1 + $0x30] sm:$0xff pattern:$0x73625140] }
  0x60   :  { %642 = vmatpush.msra.mxu0 %v154_v3  ;;  %661 = vmatpush.msra.mxu1 %v171_v4  ;;  %v1678_v32 = vld.sshfl [vmem:[#allocation1 + $0x28] sm:$0xff pattern:$0x73625140]  ;;  %v1686_v33 = vld.sshfl [vmem:[#allocation1 + $0x38] sm:$0xff pattern:$0x73625140] }
  0x61   :  { %682 = vmatpush.msra.mxu2 %v186_v5  ;;  %701 = vmatpush.msra.mxu3 %v203_v6  ;;  %v260_v34 = vld [vmem:[%s2236_s1 + $0x760] sm:$0xff]  ;;  %v277_v35 = vld [vmem:[%s2236_s1 + $0x7e8] sm:$0xff]  ;;  %v227_v36 = vld [vmem:[%s2236_s1 + $0x658] sm:$0xff] }
  0x62   :  { %643 = vmatpush.msra.mxu0 %v153_v7  ;;  %662 = vmatpush.msra.mxu1 %v170_v8  ;;  %v244_v37 = vld [vmem:[%s2236_s1 + $0x6e0] sm:$0xff]  ;;  %v259_v38 = vld [vmem:[%s2236_s1 + $0x758] sm:$0xff]  ;;  %v226_v40 = vld [vmem:[%s2236_s1 + $0x650] sm:$0xff] }
  0x63   :  { %683 = vmatpush.msra.mxu2 %v185_v9  ;;  %702 = vmatpush.msra.mxu3 %v202_v10  ;;  %v276_v39 = vld [vmem:[%s2236_s1 + $0x7e0] sm:$0xff]  ;;  %v243_v41 = vld [vmem:[%s2236_s1 + $0x6d8] sm:$0xff]  ;;  %v258_v42 = vld [vmem:[%s2236_s1 + $0x750] sm:$0xff] }
  0x64   :  { %644 = vmatpush.msra.mxu0 %v152_v11  ;;  %663 = vmatpush.msra.mxu1 %v169_v12  ;;  %v275_v43 = vld [vmem:[%s2236_s1 + $0x7d8] sm:$0xff]  ;;  %v225_v44 = vld [vmem:[%s2236_s1 + $0x648] sm:$0xff]  ;;  %v242_v45 = vld [vmem:[%s2236_s1 + $0x6d0] sm:$0xff] }
  0x65   :  { %684 = vmatpush.msra.mxu2 %v184_v13  ;;  %703 = vmatpush.msra.mxu3 %v201_v14  ;;  %v257_v46 = vld [vmem:[%s2236_s1 + $0x748] sm:$0xff]  ;;  %v274_v47 = vld [vmem:[%s2236_s1 + $0x7d0] sm:$0xff]  ;;  %v224_v48 = vld [vmem:[%s2236_s1 + $0x640] sm:$0xff] }
  0x66   :  { %645 = vmatmul.f32.vlgmr.msra.gmra.mxu0 %v1469_v25  ;;  %685 = vmatmul.f32.vlgmr.msra.gmra.mxu2 %v1471_v26  ;;  %v261_v25 = vld [vmem:[%s2236_s1 + $0x768] sm:$0xff]  ;;  %v278_v26 = vld [vmem:[%s2236_s1 + $0x7f0] sm:$0xff]  ;;  %v256_v50 = vld [vmem:[%s2236_s1 + $0x740] sm:$0xff] }
  0x67   :  { %709 = vmatpush.msrb.mxu0 %v231_v15  ;;  %749 = vmatpush.msrb.mxu2 %v263_v16  ;;  %v241_v49 = vld [vmem:[%s2236_s1 + $0x6c8] sm:$0xff]  ;;  %v223_v52 = vld [vmem:[%s2236_s1 + $0x638] sm:$0xff]  ;;  %v240_v53 = vld [vmem:[%s2236_s1 + $0x6c0] sm:$0xff] }
  0x68   :  { %664 = vmatpush.msra.mxu1 %v168_v17  ;;  %704 = vmatpush.msra.mxu3 %v200_v18  ;;  %v273_v51 = vld [vmem:[%s2236_s1 + $0x7c8] sm:$0xff]  ;;  %v255_v54 = vld [vmem:[%s2236_s1 + $0x738] sm:$0xff]  ;;  %v272_v55 = vld [vmem:[%s2236_s1 + $0x7c0] sm:$0xff] }
  0x69   :  { %665 = vmatmul.f32.vlgmr.msra.gmra.mxu1 %v1473_v27  ;;  %705 = vmatmul.f32.vlgmr.msra.gmra.mxu3 %v1481_v30  ;;  %v245_v27 = vld [vmem:[%s2236_s1 + $0x6e8] sm:$0xff]  ;;  %v222_v56 = vld [vmem:[%s2236_s1 + $0x630] sm:$0xff]  ;;  %v239_v57 = vld [vmem:[%s2236_s1 + $0x6b8] sm:$0xff] }
  0x6a   :  { %710 = vmatpush.msrb.mxu0 %v230_v19  ;;  %729 = vmatpush.msrb.mxu1 %v247_v20  ;;  %v23_v30 = vld [vmem:[%s2235_s0 + $0x28] sm:$0xff]  ;;  %v254_v58 = vld [vmem:[%s2236_s1 + $0x730] sm:$0xff]  ;;  %v271_v59 = vld [vmem:[%s2236_s1 + $0x7b8] sm:$0xff] }
  0x6b   :  { %750 = vmatpush.msrb.mxu2 %v262_v21  ;;  %769 = vmatpush.msrb.mxu3 %v279_v22  ;;  %436 = vst [vmem:[#allocation1 + $0x20] ss:$4 sm:$0xff] %v23_v30  ;;  %v221_v60 = vld [vmem:[%s2236_s1 + $0x628] sm:$0xff]  ;;  %v238_v61 = vld [vmem:[%s2236_s1 + $0x6b0] sm:$0xff]  ;;  %v220_v0 = vld [vmem:[%s2236_s1 + $0x620] sm:$0xff] }
  0x6c   :  { %711 = vmatpush.msrb.mxu0 %v229_v23  ;;  %730 = vmatpush.msrb.mxu1 %v246_v24  ;;  %v253_v62 = vld [vmem:[%s2236_s1 + $0x728] sm:$0xff]  ;;  %v270_v63 = vld [vmem:[%s2236_s1 + $0x7b0] sm:$0xff]  ;;  %v252_v2 = vld [vmem:[%s2236_s1 + $0x720] sm:$0xff] }
  0x6d   :  { %751 = vmatpush.msrb.mxu2 %v261_v25  ;;  %770 = vmatpush.msrb.mxu3 %v278_v26  ;;  %v237_v1 = vld [vmem:[%s2236_s1 + $0x6a8] sm:$0xff]  ;;  %v219_v4 = vld [vmem:[%s2236_s1 + $0x618] sm:$0xff]  ;;  %v236_v5 = vld [vmem:[%s2236_s1 + $0x6a0] sm:$0xff] }
  0x6e   :  { %712 = vmatpush.msrb.mxu0 %v228_v28  ;;  %731 = vmatpush.msrb.mxu1 %v245_v27  ;;  %v269_v3 = vld [vmem:[%s2236_s1 + $0x7a8] sm:$0xff]  ;;  %v251_v6 = vld [vmem:[%s2236_s1 + $0x718] sm:$0xff]  ;;  %v268_v7 = vld [vmem:[%s2236_s1 + $0x7a0] sm:$0xff] }
  0x6f   :  { %752 = vmatpush.msrb.mxu2 %v260_v34  ;;  %771 = vmatpush.msrb.mxu3 %v277_v35  ;;  %v218_v8 = vld [vmem:[%s2236_s1 + $0x610] sm:$0xff]  ;;  %v235_v9 = vld [vmem:[%s2236_s1 + $0x698] sm:$0xff]  ;;  %v217_v12 = vld [vmem:[%s2236_s1 + $0x608] sm:$0xff] }
  0x70   :  { %713 = vmatpush.msrb.mxu0 %v227_v36  ;;  %732 = vmatpush.msrb.mxu1 %v244_v37  ;;  %v250_v10 = vld [vmem:[%s2236_s1 + $0x710] sm:$0xff]  ;;  %v267_v11 = vld [vmem:[%s2236_s1 + $0x798] sm:$0xff]  ;;  %v249_v14 = vld [vmem:[%s2236_s1 + $0x708] sm:$0xff] }
  0x71   :  { %753 = vmatpush.msrb.mxu2 %v259_v38  ;;  %772 = vmatpush.msrb.mxu3 %v276_v39  ;;  %v234_v13 = vld [vmem:[%s2236_s1 + $0x690] sm:$0xff]  ;;  %v216_v16 = vld [vmem:[%s2236_s1 + $0x600] sm:$0xff]  ;;  %v233_v17 = vld [vmem:[%s2236_s1 + $0x688] sm:$0xff] }
  0x72   :  { %714 = vmatpush.msrb.mxu0 %v226_v40  ;;  %733 = vmatpush.msrb.mxu1 %v243_v41  ;;  %v266_v15 = vld [vmem:[%s2236_s1 + $0x790] sm:$0xff]  ;;  %v248_v18 = vld [vmem:[%s2236_s1 + $0x700] sm:$0xff]  ;;  %v265_v19 = vld [vmem:[%s2236_s1 + $0x788] sm:$0xff] }
  0x73   :  { %754 = vmatpush.msrb.mxu2 %v258_v42  ;;  %773 = vmatpush.msrb.mxu3 %v275_v43  ;;  %v295_v20 = vld [vmem:[%s2236_s1 + $0x878] sm:$0xff]  ;;  %v232_v22 = vld [vmem:[%s2236_s1 + $0x680] sm:$0xff]  ;;  %v294_v24 = vld [vmem:[%s2236_s1 + $0x870] sm:$0xff] }
  0x74   :  { %715 = vmatpush.msrb.mxu0 %v225_v44  ;;  %734 = vmatpush.msrb.mxu1 %v242_v45  ;;  %v327_v21 = vld [vmem:[%s2236_s1 + $0x978] sm:$0xff]  ;;  %v264_v23 = vld [vmem:[%s2236_s1 + $0x780] sm:$0xff]  ;;  %v326_v26 = vld [vmem:[%s2236_s1 + $0x970] sm:$0xff] }
  0x75   :  { %755 = vmatpush.msrb.mxu2 %v257_v46  ;;  %774 = vmatpush.msrb.mxu3 %v274_v47  ;;  %v311_v25 = vld [vmem:[%s2236_s1 + $0x8f8] sm:$0xff]  ;;  %v325_v27 = vld [vmem:[%s2236_s1 + $0x968] sm:$0xff]  ;;  %v292_v30 = vld [vmem:[%s2236_s1 + $0x860] sm:$0xff] }
  0x76   :  { %716 = vmatpush.msrb.mxu0 %v224_v48  ;;  %735 = vmatpush.msrb.mxu1 %v241_v49  ;;  %v343_v28 = vld [vmem:[%s2236_s1 + $0x9f8] sm:$0xff]  ;;  %v324_v34 = vld [vmem:[%s2236_s1 + $0x960] sm:$0xff]  ;;  %v341_v35 = vld [vmem:[%s2236_s1 + $0x9e8] sm:$0xff] }
  0x77   :  { %756 = vmatpush.msrb.mxu2 %v256_v50  ;;  %775 = vmatpush.msrb.mxu3 %v273_v51  ;;  %v291_v36 = vld [vmem:[%s2236_s1 + $0x858] sm:$0xff]  ;;  %v308_v37 = vld [vmem:[%s2236_s1 + $0x8e0] sm:$0xff]  ;;  %v290_v40 = vld [vmem:[%s2236_s1 + $0x850] sm:$0xff] }
  0x78   :  { %717 = vmatpush.msrb.mxu0 %v223_v52  ;;  %736 = vmatpush.msrb.mxu1 %v240_v53  ;;  %v323_v38 = vld [vmem:[%s2236_s1 + $0x958] sm:$0xff]  ;;  %v340_v39 = vld [vmem:[%s2236_s1 + $0x9e0] sm:$0xff]  ;;  %v322_v42 = vld [vmem:[%s2236_s1 + $0x950] sm:$0xff] }
  0x79   :  { %757 = vmatpush.msrb.mxu2 %v255_v54  ;;  %776 = vmatpush.msrb.mxu3 %v272_v55  ;;  %v307_v41 = vld [vmem:[%s2236_s1 + $0x8d8] sm:$0xff]  ;;  %v289_v44 = vld [vmem:[%s2236_s1 + $0x848] sm:$0xff]  ;;  %v306_v45 = vld [vmem:[%s2236_s1 + $0x8d0] sm:$0xff] }
  0x7a   :  { %718 = vmatpush.msrb.mxu0 %v222_v56  ;;  %737 = vmatpush.msrb.mxu1 %v239_v57  ;;  %v339_v43 = vld [vmem:[%s2236_s1 + $0x9d8] sm:$0xff]  ;;  %v321_v46 = vld [vmem:[%s2236_s1 + $0x948] sm:$0xff]  ;;  %v338_v47 = vld [vmem:[%s2236_s1 + $0x9d0] sm:$0xff] }
  0x7b   :  { %758 = vmatpush.msrb.mxu2 %v254_v58  ;;  %777 = vmatpush.msrb.mxu3 %v271_v59  ;;  %v288_v48 = vld [vmem:[%s2236_s1 + $0x840] sm:$0xff]  ;;  %v305_v49 = vld [vmem:[%s2236_s1 + $0x8c8] sm:$0xff]  ;;  %v287_v52 = vld [vmem:[%s2236_s1 + $0x838] sm:$0xff] }
  0x7c   :  { %719 = vmatpush.msrb.mxu0 %v221_v60  ;;  %738 = vmatpush.msrb.mxu1 %v238_v61  ;;  %v320_v50 = vld [vmem:[%s2236_s1 + $0x940] sm:$0xff]  ;;  %v337_v51 = vld [vmem:[%s2236_s1 + $0x9c8] sm:$0xff]  ;;  %v319_v54 = vld [vmem:[%s2236_s1 + $0x938] sm:$0xff] }
  0x7d   :  { %759 = vmatpush.msrb.mxu2 %v253_v62  ;;  %778 = vmatpush.msrb.mxu3 %v270_v63  ;;  %v304_v53 = vld [vmem:[%s2236_s1 + $0x8c0] sm:$0xff]  ;;  %v286_v56 = vld [vmem:[%s2236_s1 + $0x830] sm:$0xff]  ;;  %v303_v57 = vld [vmem:[%s2236_s1 + $0x8b8] sm:$0xff] }
  0x7e   :  { %720 = vmatpush.msrb.mxu0 %v220_v0  ;;  %739 = vmatpush.msrb.mxu1 %v237_v1  ;;  %v336_v55 = vld [vmem:[%s2236_s1 + $0x9c0] sm:$0xff]  ;;  %v318_v58 = vld [vmem:[%s2236_s1 + $0x930] sm:$0xff]  ;;  %v335_v59 = vld [vmem:[%s2236_s1 + $0x9b8] sm:$0xff] }
  0x7f   :  { %760 = vmatpush.msrb.mxu2 %v252_v2  ;;  %779 = vmatpush.msrb.mxu3 %v269_v3  ;;  %v285_v60 = vld [vmem:[%s2236_s1 + $0x828] sm:$0xff]  ;;  %v302_v61 = vld [vmem:[%s2236_s1 + $0x8b0] sm:$0xff]  ;;  %v284_v0 = vld [vmem:[%s2236_s1 + $0x820] sm:$0xff] }
  0x80   :  { %721 = vmatpush.msrb.mxu0 %v219_v4  ;;  %740 = vmatpush.msrb.mxu1 %v236_v5  ;;  %v317_v62 = vld [vmem:[%s2236_s1 + $0x928] sm:$0xff]  ;;  %v334_v63 = vld [vmem:[%s2236_s1 + $0x9b0] sm:$0xff]  ;;  %v316_v2 = vld [vmem:[%s2236_s1 + $0x920] sm:$0xff] }
  0x81   :  { %761 = vmatpush.msrb.mxu2 %v251_v6  ;;  %780 = vmatpush.msrb.mxu3 %v268_v7  ;;  %v301_v1 = vld [vmem:[%s2236_s1 + $0x8a8] sm:$0xff]  ;;  %v283_v4 = vld [vmem:[%s2236_s1 + $0x818] sm:$0xff]  ;;  %v300_v5 = vld [vmem:[%s2236_s1 + $0x8a0] sm:$0xff] }
  0x82   :  { %722 = vmatpush.msrb.mxu0 %v218_v8  ;;  %741 = vmatpush.msrb.mxu1 %v235_v9  ;;  %v333_v3 = vld [vmem:[%s2236_s1 + $0x9a8] sm:$0xff]  ;;  %v315_v6 = vld [vmem:[%s2236_s1 + $0x918] sm:$0xff]  ;;  %v332_v7 = vld [vmem:[%s2236_s1 + $0x9a0] sm:$0xff] }
  0x83   :  { %762 = vmatpush.msrb.mxu2 %v250_v10  ;;  %781 = vmatpush.msrb.mxu3 %v267_v11  ;;  %v282_v8 = vld [vmem:[%s2236_s1 + $0x810] sm:$0xff]  ;;  %v299_v9 = vld [vmem:[%s2236_s1 + $0x898] sm:$0xff] }
  0x84   :  { %723 = vmatpush.msrb.mxu0 %v217_v12  ;;  %742 = vmatpush.msrb.mxu1 %v234_v13  ;;  %v314_v10 = vld [vmem:[%s2236_s1 + $0x910] sm:$0xff]  ;;  %v331_v11 = vld [vmem:[%s2236_s1 + $0x998] sm:$0xff]  ;;  %v281_v12 = vld [vmem:[%s2236_s1 + $0x808] sm:$0xff] }
  0x85   :  { %763 = vmatpush.msrb.mxu2 %v249_v14  ;;  %782 = vmatpush.msrb.mxu3 %v266_v15  ;;  %v298_v13 = vld [vmem:[%s2236_s1 + $0x890] sm:$0xff]  ;;  %v313_v14 = vld [vmem:[%s2236_s1 + $0x908] sm:$0xff] }
  0x86   :  { %724 = vmatpush.msrb.mxu0 %v216_v16  ;;  %743 = vmatpush.msrb.mxu1 %v233_v17  ;;  %v330_v15 = vld [vmem:[%s2236_s1 + $0x990] sm:$0xff]  ;;  %v280_v16 = vld [vmem:[%s2236_s1 + $0x800] sm:$0xff]  ;;  %v297_v17 = vld [vmem:[%s2236_s1 + $0x888] sm:$0xff] }
  0x87   :  { %764 = vmatpush.msrb.mxu2 %v248_v18  ;;  %783 = vmatpush.msrb.mxu3 %v265_v19  ;;  %v312_v18 = vld [vmem:[%s2236_s1 + $0x900] sm:$0xff]  ;;  %v329_v19 = vld [vmem:[%s2236_s1 + $0x988] sm:$0xff] }
  0x88   :  { %725 = vmatmul.f32.vlgmr.msrb.gmra.mxu0 %v1674_v29  ;;  %765 = vmatmul.f32.vlgmr.msrb.gmra.mxu2 %v1676_v31  ;;  %v293_v29 = vld [vmem:[%s2236_s1 + $0x868] sm:$0xff]  ;;  %v310_v31 = vld [vmem:[%s2236_s1 + $0x8f0] sm:$0xff] }
  0x89   :  { %789 = vmatpush.msra.mxu0 %v295_v20  ;;  %829 = vmatpush.msra.mxu2 %v327_v21  ;;  %v437_v20 = vld.sshfl [vmem:[#allocation1] sm:$0xff pattern:$0x73625140]  ;;  %v439_v21 = vld.sshfl [vmem:[#allocation1 + $0x10] sm:$0xff pattern:$0x73625140] }
  0x8a   :  { %744 = vmatpush.msrb.mxu1 %v232_v22  ;;  %784 = vmatpush.msrb.mxu3 %v264_v23  ;;  %v359_v22 = vld [vmem:[%s2236_s1 + $0xa78] sm:$0xff] }
  0x8b   :  { %745 = vmatmul.f32.vlgmr.msrb.gmra.mxu1 %v1678_v32  ;;  %785 = vmatmul.f32.vlgmr.msrb.gmra.mxu3 %v1686_v33  ;;  %v342_v32 = vld [vmem:[%s2236_s1 + $0x9f0] sm:$0xff]  ;;  %v309_v33 = vld [vmem:[%s2236_s1 + $0x8e8] sm:$0xff]  ;;  %v391_v23 = vld [vmem:[%s2236_s1 + $0xb78] sm:$0xff] }
  0x8c   :  { %790 = vmatpush.msra.mxu0 %v294_v24  ;;  %809 = vmatpush.msra.mxu1 %v311_v25  ;;  %v296_v24 = vld [vmem:[%s2236_s1 + $0x880] sm:$0xff] }
  0x8d   :  { %830 = vmatpush.msra.mxu2 %v326_v26  ;;  %849 = vmatpush.msra.mxu3 %v343_v28  ;;  %v328_v25 = vld [vmem:[%s2236_s1 + $0x980] sm:$0xff]  ;;  %v438_v26 = vld.sshfl [vmem:[#allocation1 + $0x8] sm:$0xff pattern:$0x73625140] }
  0x8e   :  { %791 = vmatpush.msra.mxu0 %v293_v29  ;;  %810 = vmatpush.msra.mxu1 %v310_v31  ;;  %v440_v28 = vld.sshfl [vmem:[#allocation1 + $0x18] sm:$0xff pattern:$0x73625140]  ;;  %v358_v29 = vld [vmem:[%s2236_s1 + $0xa70] sm:$0xff] }
  0x8f   :  { %831 = vmatpush.msra.mxu2 %v325_v27  ;;  %850 = vmatpush.msra.mxu3 %v342_v32  ;;  %v375_v31 = vld [vmem:[%s2236_s1 + $0xaf8] sm:$0xff]  ;;  %v390_v27 = vld [vmem:[%s2236_s1 + $0xb70] sm:$0xff] }
  0x90   :  { %792 = vmatpush.msra.mxu0 %v292_v30  ;;  %811 = vmatpush.msra.mxu1 %v309_v33  ;;  %v407_v32 = vld [vmem:[%s2236_s1 + $0xbf8] sm:$0xff]  ;;  %v357_v30 = vld [vmem:[%s2236_s1 + $0xa68] sm:$0xff]  ;;  %v374_v33 = vld [vmem:[%s2236_s1 + $0xaf0] sm:$0xff] }
  0x91   :  { %832 = vmatpush.msra.mxu2 %v324_v34  ;;  %851 = vmatpush.msra.mxu3 %v341_v35  ;;  %v389_v34 = vld [vmem:[%s2236_s1 + $0xb68] sm:$0xff]  ;;  %v406_v35 = vld [vmem:[%s2236_s1 + $0xbf0] sm:$0xff] }
  0x92   :  { %793 = vmatpush.msra.mxu0 %v291_v36  ;;  %812 = vmatpush.msra.mxu1 %v308_v37  ;;  %v356_v36 = vld [vmem:[%s2236_s1 + $0xa60] sm:$0xff]  ;;  %v373_v37 = vld [vmem:[%s2236_s1 + $0xae8] sm:$0xff] }
  0x93   :  { %833 = vmatpush.msra.mxu2 %v323_v38  ;;  %852 = vmatpush.msra.mxu3 %v340_v39  ;;  %v388_v38 = vld [vmem:[%s2236_s1 + $0xb60] sm:$0xff]  ;;  %v405_v39 = vld [vmem:[%s2236_s1 + $0xbe8] sm:$0xff] }
  0x94   :  { %794 = vmatpush.msra.mxu0 %v290_v40  ;;  %813 = vmatpush.msra.mxu1 %v307_v41  ;;  %v355_v40 = vld [vmem:[%s2236_s1 + $0xa58] sm:$0xff]  ;;  %v372_v41 = vld [vmem:[%s2236_s1 + $0xae0] sm:$0xff] }
  0x95   :  { %834 = vmatpush.msra.mxu2 %v322_v42  ;;  %853 = vmatpush.msra.mxu3 %v339_v43  ;;  %v387_v42 = vld [vmem:[%s2236_s1 + $0xb58] sm:$0xff]  ;;  %v404_v43 = vld [vmem:[%s2236_s1 + $0xbe0] sm:$0xff] }
  0x96   :  { %795 = vmatpush.msra.mxu0 %v289_v44  ;;  %814 = vmatpush.msra.mxu1 %v306_v45  ;;  %v354_v44 = vld [vmem:[%s2236_s1 + $0xa50] sm:$0xff]  ;;  %v371_v45 = vld [vmem:[%s2236_s1 + $0xad8] sm:$0xff] }
  0x97   :  { %835 = vmatpush.msra.mxu2 %v321_v46  ;;  %854 = vmatpush.msra.mxu3 %v338_v47  ;;  %v386_v46 = vld [vmem:[%s2236_s1 + $0xb50] sm:$0xff]  ;;  %v403_v47 = vld [vmem:[%s2236_s1 + $0xbd8] sm:$0xff] }
  0x98   :  { %796 = vmatpush.msra.mxu0 %v288_v48  ;;  %815 = vmatpush.msra.mxu1 %v305_v49  ;;  %v353_v48 = vld [vmem:[%s2236_s1 + $0xa48] sm:$0xff]  ;;  %v370_v49 = vld [vmem:[%s2236_s1 + $0xad0] sm:$0xff] }
  0x99   :  { %836 = vmatpush.msra.mxu2 %v320_v50  ;;  %855 = vmatpush.msra.mxu3 %v337_v51  ;;  %v385_v50 = vld [vmem:[%s2236_s1 + $0xb48] sm:$0xff]  ;;  %v402_v51 = vld [vmem:[%s2236_s1 + $0xbd0] sm:$0xff] }
  0x9a   :  { %797 = vmatpush.msra.mxu0 %v287_v52  ;;  %816 = vmatpush.msra.mxu1 %v304_v53  ;;  %v352_v52 = vld [vmem:[%s2236_s1 + $0xa40] sm:$0xff]  ;;  %v369_v53 = vld [vmem:[%s2236_s1 + $0xac8] sm:$0xff] }
  0x9b   :  { %837 = vmatpush.msra.mxu2 %v319_v54  ;;  %856 = vmatpush.msra.mxu3 %v336_v55  ;;  %v384_v54 = vld [vmem:[%s2236_s1 + $0xb40] sm:$0xff]  ;;  %v401_v55 = vld [vmem:[%s2236_s1 + $0xbc8] sm:$0xff] }
  0x9c   :  { %798 = vmatpush.msra.mxu0 %v286_v56  ;;  %817 = vmatpush.msra.mxu1 %v303_v57  ;;  %v351_v56 = vld [vmem:[%s2236_s1 + $0xa38] sm:$0xff]  ;;  %v368_v57 = vld [vmem:[%s2236_s1 + $0xac0] sm:$0xff] }
  0x9d   :  { %838 = vmatpush.msra.mxu2 %v318_v58  ;;  %857 = vmatpush.msra.mxu3 %v335_v59  ;;  %v383_v58 = vld [vmem:[%s2236_s1 + $0xb38] sm:$0xff]  ;;  %v400_v59 = vld [vmem:[%s2236_s1 + $0xbc0] sm:$0xff] }
  0x9e   :  { %799 = vmatpush.msra.mxu0 %v285_v60  ;;  %818 = vmatpush.msra.mxu1 %v302_v61  ;;  %v350_v60 = vld [vmem:[%s2236_s1 + $0xa30] sm:$0xff]  ;;  %v367_v61 = vld [vmem:[%s2236_s1 + $0xab8] sm:$0xff] }
  0x9f   :  { %839 = vmatpush.msra.mxu2 %v317_v62  ;;  %858 = vmatpush.msra.mxu3 %v334_v63  ;;  %v382_v62 = vld [vmem:[%s2236_s1 + $0xb30] sm:$0xff]  ;;  %v399_v63 = vld [vmem:[%s2236_s1 + $0xbb8] sm:$0xff] }
  0xa0   :  { %800 = vmatpush.msra.mxu0 %v284_v0  ;;  %819 = vmatpush.msra.mxu1 %v301_v1  ;;  %v349_v0 = vld [vmem:[%s2236_s1 + $0xa28] sm:$0xff]  ;;  %v366_v1 = vld [vmem:[%s2236_s1 + $0xab0] sm:$0xff] }
  0xa1   :  { %840 = vmatpush.msra.mxu2 %v316_v2  ;;  %859 = vmatpush.msra.mxu3 %v333_v3  ;;  %v381_v2 = vld [vmem:[%s2236_s1 + $0xb28] sm:$0xff]  ;;  %v398_v3 = vld [vmem:[%s2236_s1 + $0xbb0] sm:$0xff] }
  0xa2   :  { %801 = vmatpush.msra.mxu0 %v283_v4  ;;  %820 = vmatpush.msra.mxu1 %v300_v5  ;;  %v348_v4 = vld [vmem:[%s2236_s1 + $0xa20] sm:$0xff]  ;;  %v365_v5 = vld [vmem:[%s2236_s1 + $0xaa8] sm:$0xff] }
  0xa3   :  { %841 = vmatpush.msra.mxu2 %v315_v6  ;;  %860 = vmatpush.msra.mxu3 %v332_v7  ;;  %v380_v6 = vld [vmem:[%s2236_s1 + $0xb20] sm:$0xff]  ;;  %v397_v7 = vld [vmem:[%s2236_s1 + $0xba8] sm:$0xff] }
  0xa4   :  { %802 = vmatpush.msra.mxu0 %v282_v8  ;;  %821 = vmatpush.msra.mxu1 %v299_v9  ;;  %v347_v8 = vld [vmem:[%s2236_s1 + $0xa18] sm:$0xff]  ;;  %v364_v9 = vld [vmem:[%s2236_s1 + $0xaa0] sm:$0xff] }
  0xa5   :  { %842 = vmatpush.msra.mxu2 %v314_v10  ;;  %861 = vmatpush.msra.mxu3 %v331_v11  ;;  %v379_v10 = vld [vmem:[%s2236_s1 + $0xb18] sm:$0xff]  ;;  %v396_v11 = vld [vmem:[%s2236_s1 + $0xba0] sm:$0xff] }
  0xa6   :  { %803 = vmatpush.msra.mxu0 %v281_v12  ;;  %822 = vmatpush.msra.mxu1 %v298_v13  ;;  %v346_v12 = vld [vmem:[%s2236_s1 + $0xa10] sm:$0xff]  ;;  %v363_v13 = vld [vmem:[%s2236_s1 + $0xa98] sm:$0xff] }
  0xa7   :  { %843 = vmatpush.msra.mxu2 %v313_v14  ;;  %862 = vmatpush.msra.mxu3 %v330_v15  ;;  %v378_v14 = vld [vmem:[%s2236_s1 + $0xb10] sm:$0xff]  ;;  %v395_v15 = vld [vmem:[%s2236_s1 + $0xb98] sm:$0xff] }
  0xa8   :  { %804 = vmatpush.msra.mxu0 %v280_v16  ;;  %823 = vmatpush.msra.mxu1 %v297_v17  ;;  %v345_v16 = vld [vmem:[%s2236_s1 + $0xa08] sm:$0xff]  ;;  %v362_v17 = vld [vmem:[%s2236_s1 + $0xa90] sm:$0xff] }
  0xa9   :  { %844 = vmatpush.msra.mxu2 %v312_v18  ;;  %863 = vmatpush.msra.mxu3 %v329_v19  ;;  %v377_v18 = vld [vmem:[%s2236_s1 + $0xb08] sm:$0xff]  ;;  %v394_v19 = vld [vmem:[%s2236_s1 + $0xb90] sm:$0xff] }
  0xaa   :  { %805 = vmatmul.f32.vlgmr.msra.gmra.mxu0 %v437_v20  ;;  %845 = vmatmul.f32.vlgmr.msra.gmra.mxu2 %v439_v21  ;;  %v344_v20 = vld [vmem:[%s2236_s1 + $0xa00] sm:$0xff]  ;;  %v361_v21 = vld [vmem:[%s2236_s1 + $0xa88] sm:$0xff] }
  0xab   :  { %869 = vmatpush.msrb.mxu0 %v359_v22  ;;  %909 = vmatpush.msrb.mxu2 %v391_v23  ;;  %v376_v22 = vld [vmem:[%s2236_s1 + $0xb00] sm:$0xff]  ;;  %v393_v23 = vld [vmem:[%s2236_s1 + $0xb88] sm:$0xff] }
  0xac   :  { %824 = vmatpush.msra.mxu1 %v296_v24  ;;  %864 = vmatpush.msra.mxu3 %v328_v25  ;;  %v441_v24 = vld.sshfl [vmem:[#allocation1 + $0x20] sm:$0xff pattern:$0x73625140]  ;;  %v443_v25 = vld.sshfl [vmem:[#allocation1 + $0x30] sm:$0xff pattern:$0x73625140] }
  0xad   :  { %825 = vmatmul.f32.vlgmr.msra.gmra.mxu1 %v438_v26  ;;  %865 = vmatmul.f32.vlgmr.msra.gmra.mxu3 %v440_v28  ;;  %v360_v26 = vld [vmem:[%s2236_s1 + $0xa80] sm:$0xff] }
  0xae   :  { %870 = vmatpush.msrb.mxu0 %v358_v29  ;;  %889 = vmatpush.msrb.mxu1 %v375_v31  ;;  %v392_v28 = vld [vmem:[%s2236_s1 + $0xb80] sm:$0xff]  ;;  %v442_v29 = vld.sshfl [vmem:[#allocation1 + $0x28] sm:$0xff pattern:$0x73625140]  ;;  %s1001_s1 = smov [#allocation3]  }
  0xaf   :  { %910 = vmatpush.msrb.mxu2 %v390_v27  ;;  %929 = vmatpush.msrb.mxu3 %v407_v32  ;;  %v444_v31 = vld.sshfl [vmem:[#allocation1 + $0x38] sm:$0xff pattern:$0x73625140]  ;;  %s961_s20 = sshll.u32 %s1001_s1, 4  ;;  %s962_s20 = int_to_ptr.vmem [resolvable:$true] %s961_s20 }
  0xb0   :  { %871 = vmatpush.msrb.mxu0 %v357_v30  ;;  %890 = vmatpush.msrb.mxu1 %v374_v33 }
  0xb1   :  { %911 = vmatpush.msrb.mxu2 %v389_v34  ;;  %930 = vmatpush.msrb.mxu3 %v406_v35 }
  0xb2   :  { %872 = vmatpush.msrb.mxu0 %v356_v36  ;;  %891 = vmatpush.msrb.mxu1 %v373_v37 }
  0xb3   :  { %912 = vmatpush.msrb.mxu2 %v388_v38  ;;  %931 = vmatpush.msrb.mxu3 %v405_v39 }
  0xb4   :  { %873 = vmatpush.msrb.mxu0 %v355_v40  ;;  %892 = vmatpush.msrb.mxu1 %v372_v41 }
  0xb5   :  { %913 = vmatpush.msrb.mxu2 %v387_v42  ;;  %932 = vmatpush.msrb.mxu3 %v404_v43 }
  0xb6   :  { %874 = vmatpush.msrb.mxu0 %v354_v44  ;;  %893 = vmatpush.msrb.mxu1 %v371_v45 }
  0xb7   :  { %914 = vmatpush.msrb.mxu2 %v386_v46  ;;  %933 = vmatpush.msrb.mxu3 %v403_v47 }
  0xb8   :  { %875 = vmatpush.msrb.mxu0 %v353_v48  ;;  %894 = vmatpush.msrb.mxu1 %v370_v49 }
  0xb9   :  { %915 = vmatpush.msrb.mxu2 %v385_v50  ;;  %934 = vmatpush.msrb.mxu3 %v402_v51  ;;  %v1000_v51 = vmov 0.0  }
  0xba   :  { %876 = vmatpush.msrb.mxu0 %v352_v52  ;;  %895 = vmatpush.msrb.mxu1 %v369_v53  ;;  %16 = vst [vmem:[#allocation2] sm:$0x3] %v1000_v51 }
  0xbb   :  { %916 = vmatpush.msrb.mxu2 %v384_v54  ;;  %935 = vmatpush.msrb.mxu3 %v401_v55 }
  0xbc   :  { %877 = vmatpush.msrb.mxu0 %v351_v56  ;;  %896 = vmatpush.msrb.mxu1 %v368_v57 }
  0xbd   :  { %917 = vmatpush.msrb.mxu2 %v383_v58  ;;  %936 = vmatpush.msrb.mxu3 %v400_v59 }
  0xbe   :  { %878 = vmatpush.msrb.mxu0 %v350_v60  ;;  %897 = vmatpush.msrb.mxu1 %v367_v61 }
  0xbf   :  { %918 = vmatpush.msrb.mxu2 %v382_v62  ;;  %937 = vmatpush.msrb.mxu3 %v399_v63  ;;  %v486_v32 = vpop.f32.mrf.mxu0 }
  0xc0   :  { %879 = vmatpush.msrb.mxu0 %v349_v0  ;;  %898 = vmatpush.msrb.mxu1 %v366_v1 }
  0xc1   :  { %919 = vmatpush.msrb.mxu2 %v381_v2  ;;  %938 = vmatpush.msrb.mxu3 %v398_v3 }
  0xc2   :  { %880 = vmatpush.msrb.mxu0 %v348_v4  ;;  %899 = vmatpush.msrb.mxu1 %v365_v5  ;;  %v506_v27 = vpop.f32.mrf.mxu1 }
  0xc3   :  { %920 = vmatpush.msrb.mxu2 %v380_v6  ;;  %939 = vmatpush.msrb.mxu3 %v397_v7  ;;  %v507_v30 = vadd.f32 %v506_v27, %v486_v32  ;;  %v526_v33 = vpop.f32.mrf.mxu2 }
  0xc4   :  { %881 = vmatpush.msrb.mxu0 %v347_v8  ;;  %900 = vmatpush.msrb.mxu1 %v364_v9 }
  0xc5   :  { %921 = vmatpush.msrb.mxu2 %v379_v10  ;;  %940 = vmatpush.msrb.mxu3 %v396_v11  ;;  %v527_v34 = vadd.f32 %v526_v33, %v507_v30 }
  0xc6   :  { %882 = vmatpush.msrb.mxu0 %v346_v12  ;;  %901 = vmatpush.msrb.mxu1 %v363_v13  ;;  %v546_v35 = vpop.f32.mrf.mxu3  ;;  %v17_v12 = vld [vmem:[#allocation2] sm:$0x3] }
  0xc7   :  { %922 = vmatpush.msrb.mxu2 %v378_v14  ;;  %941 = vmatpush.msrb.mxu3 %v395_v15  ;;  %v547_v36 = vadd.f32 %v546_v35, %v527_v34 }
  0xc8   :  { %883 = vmatpush.msrb.mxu0 %v345_v16  ;;  %902 = vmatpush.msrb.mxu1 %v362_v17 }
  0xc9   :  { %923 = vmatpush.msrb.mxu2 %v377_v18  ;;  %942 = vmatpush.msrb.mxu3 %v394_v19  ;;  %v566_v37 = vpop.f32.mrf.mxu0 }
  0xca   :  { %884 = vmatpush.msrb.mxu0 %v344_v20  ;;  %903 = vmatpush.msrb.mxu1 %v361_v21  ;;  %v567_v38 = vadd.f32 %v566_v37, %v547_v36 }
  0xcb   :  { %924 = vmatpush.msrb.mxu2 %v376_v22  ;;  %943 = vmatpush.msrb.mxu3 %v393_v23 }
  0xcc   :  { %885 = vmatmul.f32.vlgmr.msrb.gmra.mxu0 %v441_v24  ;;  %925 = vmatmul.f32.vlgmr.msrb.gmra.mxu2 %v443_v25  ;;  %v586_v39 = vpop.f32.mrf.mxu1 }
  0xcd   :  { %904 = vmatpush.msrb.mxu1 %v360_v26  ;;  %944 = vmatpush.msrb.mxu3 %v392_v28  ;;  %v587_v40 = vadd.f32 %v586_v39, %v567_v38  ;;  %v606_v41 = vpop.f32.mrf.mxu2 }
  0xce   :  { %905 = vmatmul.f32.vlgmr.msrb.gmra.mxu1 %v442_v29  ;;  %945 = vmatmul.f32.vlgmr.msrb.gmra.mxu3 %v444_v31 }
  0xcf   :  { %v607_v42 = vadd.f32 %v606_v41, %v587_v40 }
  0xd0   :  { %v626_v43 = vpop.f32.mrf.mxu3 }
  0xd1   :  { %v627_v45 = vadd.f32 %v626_v43, %v607_v42 }
  0xe3   :  { %v646_v44 = vpop.f32.mrf.mxu0 }
  0xe4   :  { %v647_v46 = vadd.f32 %v646_v44, %v627_v45 }
  0xe6   :  { %v666_v47 = vpop.f32.mrf.mxu1 }
  0xe7   :  { %v667_v49 = vadd.f32 %v666_v47, %v647_v46 }
  0xe9   :  { %v686_v48 = vpop.f32.mrf.mxu2 }
  0xea   :  { %v687_v50 = vadd.f32 %v686_v48, %v667_v49 }
  0xec   :  { %v706_v52 = vpop.f32.mrf.mxu3 }
  0xed   :  { %v707_v54 = vadd.f32 %v706_v52, %v687_v50 }
 0x105   :  { %v726_v53 = vpop.f32.mrf.mxu0 }
 0x106   :  { %v727_v55 = vadd.f32 %v726_v53, %v707_v54 }
 0x108   :  { %v746_v56 = vpop.f32.mrf.mxu1 }
 0x109   :  { %v747_v58 = vadd.f32 %v746_v56, %v727_v55 }
 0x10b   :  { %v766_v57 = vpop.f32.mrf.mxu2 }
 0x10c   :  { %v767_v59 = vadd.f32 %v766_v57, %v747_v58 }
 0x10e   :  { %v786_v60 = vpop.f32.mrf.mxu3 }
 0x10f   :  { %v787_v62 = vadd.f32 %v786_v60, %v767_v59 }
 0x127   :  { %v806_v61 = vpop.f32.mrf.mxu0 }
 0x128   :  { %v807_v63 = vadd.f32 %v806_v61, %v787_v62 }
 0x12a   :  { %v826_v0 = vpop.f32.mrf.mxu1 }
 0x12b   :  { %v827_v2 = vadd.f32 %v826_v0, %v807_v63 }
 0x12d   :  { %v846_v1 = vpop.f32.mrf.mxu2 }
 0x12e   :  { %v847_v3 = vadd.f32 %v846_v1, %v827_v2 }
 0x130   :  { %v866_v4 = vpop.f32.mrf.mxu3 }
 0x131   :  { %v867_v5 = vadd.f32 %v866_v4, %v847_v3 }
 0x149   :  { %v886_v6 = vpop.f32.mrf.mxu0 }
 0x14a   :  { %v887_v7 = vadd.f32 %v886_v6, %v867_v5 }
 0x14b   :  { %v906_v8 = vpop.f32.mrf.mxu1 }
 0x14c   :  { %v907_v9 = vadd.f32 %v906_v8, %v887_v7 }
 0x14f   :  { %v926_v10 = vpop.f32.mrf.mxu2 }
 0x150   :  { %v927_v11 = vadd.f32 %v926_v10, %v907_v9 }
 0x151   :  { %v946_v13 = vpop.f32.mrf.mxu3 }
 0x152   :  { %v947_v14 = vadd.f32 %v946_v13, %v927_v11 }
 0x154   :  { %v949_v15 = vadd.f32 %v947_v14, %v17_v12 }
 0x156   :  { %950 = vst [vmem:[#allocation2] sm:$0x3] %v949_v15 }
 0x15d   :  { %v954_v16 = vld [vmem:[#allocation2] sm:$0x3] }
 0x15e   :  { %955 = vst [vmem:[#allocation3] sm:$0x3] %v954_v16 }
 0x15f   :  { %966 = dma.vmem_to_hbm [thread:$0]  %s962_s20, 32, %s964_s23, [#allocation4]  }
 0x160   :  { %998 = dma.done.wait [#allocation4], 32  }
 0x161   :  { %999 = vsyncadd [#allocation4], 4294967264 }
 0x162   :  { %971 = vsyncpa [#allocation4], 1 }

</bundles_post_ra>
